<compile_context>
chip_gen: v7x
topology: tpu7x:2x2x1
jax: 0.10.0
libtpu: 0.0.40
codegen_flags: <defaults>
</compile_context>

<pallas_src>
import jax
import jax.numpy as jnp
from jax.experimental import pallas as pl
from jax.experimental.pallas import tpu as pltpu

NEG_SLOPE = 0.1           # LeakyReLU negative slope (conf.activator_negative_slope)
BN_EPS = 1e-5
NEG_BIG = -1e30           # finite "-inf" (so 0.0 * NEG_BIG == 0.0 in the pool matmul)

# (name, kernel_size, cin, cout) -- fixed by the synthetic configuration.
_LAYERS = (
    ("block0", 3, 4, 8),
    ("block1", 3, 8, 16),
    ("nin0",   3, 16, 16),
    ("nin1",   1, 16, 16),
    ("nin2",   1, 16, 16),
)
_K_MAX = 9 * 16                                                   # widest im2col K (nin0)
_ROW_OFF = tuple(sum(l[3] for l in _LAYERS[:i]) for i in range(len(_LAYERS)))
_TOTAL_ROWS = sum(l[3] for l in _LAYERS)                          # 72


def _leaky(z):
    return jnp.where(z >= 0, z, NEG_SLOPE * z)


# ---------------------------------------------------------------------------
# Fused kernel: whole FeatureExtractor forward for one batch tile.
# ---------------------------------------------------------------------------
def _build_kernel(b_tile, h, w):
    h2, w2 = h // 2, w // 2
    l1 = b_tile * h * w             # lane count before the pool
    l2 = b_tile * h2 * w2           # lane count after the pool

    def kernel(x_ref, w_ref, m_ref, sel_ref, gap_ref, o_ref):

        def layer_params(idx):
            _, k, cin, cout = _LAYERS[idx]
            r0 = _ROW_OFF[idx]
            blk = w_ref[r0:r0 + cout, :]                      # (cout, K_MAX + 2)
            return (blk[:, :k * k * cin],                     # BN-folded weights
                    blk[:, _K_MAX:_K_MAX + 1],                # BN-folded bias  (cout, 1)
                    blk[:, _K_MAX + 1:_K_MAX + 2],            # BN beta shift   (cout, 1)
                    cin)

        def taps(x, width, lanes):
            """Yield (t, x shifted by the 3x3 tap offset) as (C, lanes) values.

            One lane-padded copy keeps every static slice in-bounds; row /
            image boundary crossings are handled by the precomputed masks, so
            the flat (b, h, w) lane layout is kept throughout.
            """
            pad = width + 1
            fill = jnp.zeros((x.shape[0], pad), jnp.float32)
            xp = jnp.concatenate([fill, x, fill], axis=1)
            for kh in range(3):
                for kw in range(3):
                    off = (kh - 1) * width + (kw - 1)
                    yield kh * 3 + kw, xp[:, pad + off:pad + off + lanes]

        def conv3x3(x, idx, width, lanes, mask_row0):
            wmat, bias, shift, cin = layer_params(idx)
            acc = None
            for t, tap in taps(x, width, lanes):
                if t != 4:                                    # centre tap needs no mask
                    tap = tap * m_ref[mask_row0 + t:mask_row0 + t + 1, :lanes]
                prod = jnp.dot(wmat[:, t * cin:(t + 1) * cin], tap,
                               preferred_element_type=jnp.float32)
                acc = prod if acc is None else acc + prod
            return _leaky(acc + bias) + shift

        def conv1x1(x, idx):
            wmat, bias, shift, _ = layer_params(idx)
            z = jnp.dot(wmat, x, preferred_element_type=jnp.float32) + bias
            return _leaky(z) + shift

        def maxpool(x, width, lanes, mask_row0):
            m = None
            for t, tap in taps(x, width, lanes):
                if t != 4:
                    tap = tap + m_ref[mask_row0 + t:mask_row0 + t + 1, :lanes]
                m = tap if m is None else jnp.maximum(m, tap)
            # Stride-2 (even h, even w) subsample as a single MXU matmul
            # against a 0/1 selection matrix -> stays in the flat lane layout.
            return jnp.dot(m, sel_ref[...], preferred_element_type=jnp.float32)

        x = x_ref[...]                                        # (Cin, l1)
        y = conv3x3(x, 0, w, l1, 0)                           # conv0 3x3: 4 -> 8
        y = conv3x3(y, 1, w, l1, 0)                           # conv1 3x3: 8 -> 16
        y = maxpool(y, w, l1, 9)                              # 16x16 -> 8x8
        y = conv3x3(y, 2, w2, l2, 18)                         # nin0 3x3: 16 -> 16
        y = conv1x1(y, 3)                                     # nin 1x1
        y = conv1x1(y, 4)                                     # nin 1x1
        # AdaptiveAvgPool2d(1) as a matmul: (16, l2) @ (l2, b_tile).
        gap = jnp.dot(y, gap_ref[...], preferred_element_type=jnp.float32)
        o_ref[0] = gap.astype(o_ref.dtype)                    # (cout, b_tile)

    return kernel


# ---------------------------------------------------------------------------
# Wrapper-side constant construction.
# ---------------------------------------------------------------------------
def _conv_masks(h, w):
    """(9, h*w) 0/1 masks; tap (kh, kw) is valid where the shifted read stays
    inside the same image (row-major (h, w) flattening)."""
    hh = jnp.arange(h)
    ww = jnp.arange(w)
    h_ok = (hh >= 1, jnp.ones((h,), bool), hh <= h - 2)
    w_ok = (ww >= 1, jnp.ones((w,), bool), ww <= w - 2)
    rows = []
    for kh in range(3):
        for kw in range(3):
            rows.append((h_ok[kh][:, None] & w_ok[kw][None, :]).reshape(-1))
    return jnp.stack(rows).astype(jnp.float32)


def _pack_params(params):
    """Fold eval-mode BN into each conv and pack all layers into one slab.

    Slab layout: (72, 146) f32; rows = concatenated per-layer Cout blocks,
    cols [0 : 9*cin) = BN-scaled weights (tap-major, channel-minor),
    col 144 = BN-scaled bias, col 145 = BN beta.
    """
    slab = jnp.zeros((_TOTAL_ROWS, _K_MAX + 2), jnp.float32)
    for idx, (name, k, cin, cout) in enumerate(_LAYERS):
        wgt, b, gamma, beta = params[name]                    # wgt: (k, k, cin, cout) HWIO
        # Eval-mode BN (running_mean=0, running_var=1). The fold
        # LeakyReLU(scale * z) == scale * LeakyReLU(z) requires scale > 0
        # (true for default gamma=1; trained gamma <= 0 would break it).
        scale = gamma / jnp.sqrt(1.0 + BN_EPS)
        wmat = jnp.transpose(wgt, (3, 0, 1, 2)).reshape(cout, k * k * cin)
        wmat = wmat * scale[:, None]
        r0 = _ROW_OFF[idx]
        slab = slab.at[r0:r0 + cout, :k * k * cin].set(wmat)
        slab = slab.at[r0:r0 + cout, _K_MAX].set(scale * b)
        slab = slab.at[r0:r0 + cout, _K_MAX + 1].set(beta)
    return slab


def feature_extractor_forward(x_nchw, params, b_tile=None):
    """x_nchw: (N, Cin, H, W) float32 (PyTorch layout). Returns (N, 16)."""
    x = x_nchw.astype(jnp.float32)
    n, cin, h, w = x.shape
    h2, w2 = h // 2, w // 2
    if b_tile is None:
        # Largest divisor of n that keeps >= 2 grid steps (v7x has 2 TCs) and a
        # small pool-selection matrix; falls back to 1 for tiny batches.
        b_tile = 1
        for cand in range(min(8, n // 2), 1, -1):
            if n % cand == 0:
                b_tile = cand
                break
    assert n % b_tile == 0
    num_steps = n // b_tile
    l1 = b_tile * h * w
    l2 = b_tile * h2 * w2
    cout = _LAYERS[-1][3]

    # Wrapper-side layout plumbing (one-time XLA ops in HBM): channels on the
    # sublane axis, batch*H*W flattened on the (dense) lane axis.
    x_flat = jnp.transpose(x, (1, 0, 2, 3)).reshape(cin, n * h * w)

    w_slab = _pack_params(params)                             # (72, 146)

    m1 = jnp.tile(_conv_masks(h, w), (1, b_tile))             # conv masks, pre-pool
    m_pool = (1.0 - m1) * NEG_BIG                             # additive masks for the max
    m2 = jnp.tile(_conv_masks(h2, w2), (1, b_tile))           # conv masks, post-pool
    m2 = jnp.pad(m2, ((0, 0), (0, l1 - l2)))
    mask_slab = jnp.concatenate([m1, m_pool, m2], axis=0)     # (27, l1)

    # 0/1 selection matrix for the stride-2 pool subsample (block diagonal over
    # the b_tile images). For very large tiles switch to a reshape-based pick.
    q = jnp.arange(l2)
    qb, qr = q // (h2 * w2), q % (h2 * w2)
    src = qb * (h * w) + (qr // w2) * (2 * w) + (qr % w2) * 2
    sel_pool = jnp.zeros((l1, l2), jnp.float32).at[src, q].set(1.0)

    # Global average pool as a matmul (per-image column of 1/(h2*w2)).
    p = jnp.arange(l2)
    gap_mat = (p[:, None] // (h2 * w2) ==
               jnp.arange(b_tile)[None, :]).astype(jnp.float32) / (h2 * w2)

    out = pl.pallas_call(
        _build_kernel(b_tile, h, w),
        out_shape=jax.ShapeDtypeStruct((num_steps, cout, b_tile), jnp.float32),
        grid=(num_steps,),
        in_specs=[
            pl.BlockSpec((cin, l1), lambda i: (0, i)),        # per-step image tile
            pl.BlockSpec(w_slab.shape, lambda i: (0, 0)),     # packed params (fetched once)
            pl.BlockSpec(mask_slab.shape, lambda i: (0, 0)),  # boundary masks
            pl.BlockSpec(sel_pool.shape, lambda i: (0, 0)),   # pool subsample selector
            pl.BlockSpec(gap_mat.shape, lambda i: (0, 0)),    # global-avg-pool matrix
        ],
        out_specs=pl.BlockSpec((1, cout, b_tile), lambda i: (i, 0, 0)),
        compiler_params=pltpu.CompilerParams(
            dimension_semantics=("parallel",),                # batch tiles independent
            vmem_limit_bytes=32 * 1024 * 1024),
    )(x_flat, w_slab, mask_slab, sel_pool, gap_mat)

    # (num_steps, cout, b_tile) -> (N, cout)
    return jnp.transpose(out, (0, 2, 1)).reshape(n, cout)


# ---------------------------------------------------------------------------
# Pure-JAX reference (mirrors the PyTorch module, eval-mode BN).
# ---------------------------------------------------------------------------
def feature_extractor_reference(x_nchw, params):
    x = x_nchw.astype(jnp.float32)

    def conv_block(x, p, padding):
        wgt, b, gamma, beta = p
        w_oihw = jnp.transpose(wgt, (3, 2, 0, 1))
        y = jax.lax.conv_general_dilated(
            x, w_oihw, window_strides=(1, 1),
            padding=((padding, padding), (padding, padding)),
            dimension_numbers=("NCHW", "OIHW", "NCHW"),
            precision=jax.lax.Precision.HIGHEST)
        y = y + b[None, :, None, None]
        y = jnp.where(y >= 0, y, NEG_SLOPE * y)
        scale = gamma / jnp.sqrt(1.0 + BN_EPS)
        return y * scale[None, :, None, None] + beta[None, :, None, None]

    x = conv_block(x, params["block0"], 1)
    x = conv_block(x, params["block1"], 1)
    x = jax.lax.reduce_window(
        x, -jnp.inf, jax.lax.max,
        window_dimensions=(1, 1, 3, 3), window_strides=(1, 1, 2, 2),
        padding=((0, 0), (0, 0), (1, 1), (1, 1)))
    x = conv_block(x, params["nin0"], 1)
    x = conv_block(x, params["nin1"], 0)
    x = conv_block(x, params["nin2"], 0)
    return jnp.mean(x, axis=(2, 3))


# ---------------------------------------------------------------------------
# Deterministic parameter init (mimics PyTorch Conv2d defaults; BN gamma=1).
# ---------------------------------------------------------------------------
def init_params(key):
    params = {}
    for i, (name, k, cin, cout) in enumerate(_LAYERS):
        kw_, kb_ = jax.random.split(jax.random.fold_in(key, i))
        fan_in = k * k * cin
        bound = 1.0 / (fan_in ** 0.5)
        wgt = jax.random.uniform(kw_, (k, k, cin, cout), jnp.float32, -bound, bound)
        b = jax.random.uniform(kb_, (cout,), jnp.float32, -bound, bound)
        params[name] = (wgt, b,
                        jnp.ones((cout,), jnp.float32),
                        jnp.zeros((cout,), jnp.float32))
    return params


if __name__ == "__main__":
    key = jax.random.PRNGKey(0)
    k_x, k_p = jax.random.split(key)

    N, C_IN, H, W = 2, 4, 16, 16
    x = jax.random.normal(k_x, (N, C_IN, H, W), jnp.float32)   # PyTorch NCHW
    params = init_params(k_p)

    feats = feature_extractor_forward(x, params)
    feats = jax.block_until_ready(feats)

    assert feats.shape == (N, 16), feats.shape
    assert bool(jnp.all(jnp.isfinite(feats)))

    ref = feature_extractor_reference(x, params)
    max_err = float(jnp.max(jnp.abs(feats - ref)))
    assert bool(jnp.allclose(feats, ref, rtol=1e-3, atol=1e-4)), (
        "max abs err = " + str(max_err))

    print("KERNEL_OK")
</pallas_src>

<mosaic_0001>
module attributes {stable_mosaic.version = 11 : i64} {
  func.func @kernel(%arg0: i32, %arg1: memref<4x256xf32, #tpu.memory_space<vmem>>, %arg2: memref<72x146xf32, #tpu.memory_space<vmem>>, %arg3: memref<27x256xf32, #tpu.memory_space<vmem>>, %arg4: memref<256x64xf32, #tpu.memory_space<vmem>>, %arg5: memref<64x1xf32, #tpu.memory_space<vmem>>, %arg6: memref<1x16x1xf32, #tpu.memory_space<vmem>>) attributes {dimension_semantics = [#tpu.dimension_semantics<parallel>], iteration_bounds = array<i64: 2>, scalar_prefetch = 0 : i64, scratch_operands = 0 : i64, tpu.core_type = #tpu.core_type<tc>, window_params = [{transform_indices = @transform_0, window_bounds = array<i64: 4, 256>}, {pipeline_mode = #tpu.pipeline_mode<synchronous>, transform_indices = @transform_1, window_bounds = array<i64: 72, 146>}, {pipeline_mode = #tpu.pipeline_mode<synchronous>, transform_indices = @transform_2, window_bounds = array<i64: 27, 256>}, {pipeline_mode = #tpu.pipeline_mode<synchronous>, transform_indices = @transform_3, window_bounds = array<i64: 256, 64>}, {pipeline_mode = #tpu.pipeline_mode<synchronous>, transform_indices = @transform_4, window_bounds = array<i64: 64, 1>}, {transform_indices = @transform_5, window_bounds = array<i64: 1, 16, 1>}]} {
    %c0 = arith.constant 0 : index
    %c0_0 = arith.constant 0 : index
    %0 = vector.load %arg1[%c0, %c0_0] : memref<4x256xf32, #tpu.memory_space<vmem>>, vector<4x256xf32>
    %c0_1 = arith.constant 0 : index
    %c0_2 = arith.constant 0 : index
    %1 = vector.load %arg2[%c0_1, %c0_2] : memref<72x146xf32, #tpu.memory_space<vmem>>, vector<8x146xf32>
    %2 = vector.extract_strided_slice %1 {offsets = [0, 0], sizes = [8, 36], strides = [1, 1]} : vector<8x146xf32> to vector<8x36xf32>
    %3 = vector.extract_strided_slice %1 {offsets = [0, 144], sizes = [8, 1], strides = [1, 1]} : vector<8x146xf32> to vector<8x1xf32>
    %4 = vector.extract_strided_slice %1 {offsets = [0, 145], sizes = [8, 1], strides = [1, 1]} : vector<8x146xf32> to vector<8x1xf32>
    %cst = arith.constant 0.000000e+00 : f32
    %5 = vector.broadcast %cst : f32 to vector<4x17xf32>
    %6 = tpu.concatenate %5, %0, %5 in 1 : vector<4x17xf32>, vector<4x256xf32>, vector<4x17xf32> -> vector<4x290xf32>
    %7 = vector.extract_strided_slice %6 {offsets = [0, 0], sizes = [4, 256], strides = [1, 1]} : vector<4x290xf32> to vector<4x256xf32>
    %c0_3 = arith.constant 0 : index
    %c0_4 = arith.constant 0 : index
    %8 = vector.load %arg3[%c0_3, %c0_4] : memref<27x256xf32, #tpu.memory_space<vmem>>, vector<1x256xf32>
    %9 = vector.broadcast %8 : vector<1x256xf32> to vector<4x256xf32>
    %10 = arith.mulf %7, %9 : vector<4x256xf32>
    %11 = vector.extract_strided_slice %2 {offsets = [0, 0], sizes = [8, 4], strides = [1, 1]} : vector<8x36xf32> to vector<8x4xf32>
    %cst_5 = arith.constant dense<0.000000e+00> : vector<8x256xf32>
    %12 = tpu.matmul %11, %10, %cst_5 {dimension_numbers = #tpu.dot_dimension_numbers<[1], [0], [0], [1], [0, 0, 1, 1], [], []>} : vector<8x4xf32>, vector<4x256xf32>, vector<8x256xf32> -> vector<8x256xf32>
    %13 = vector.extract_strided_slice %6 {offsets = [0, 1], sizes = [4, 256], strides = [1, 1]} : vector<4x290xf32> to vector<4x256xf32>
    %c1 = arith.constant 1 : index
    %c0_6 = arith.constant 0 : index
    %14 = vector.load %arg3[%c1, %c0_6] : memref<27x256xf32, #tpu.memory_space<vmem>>, vector<1x256xf32>
    %15 = vector.broadcast %14 : vector<1x256xf32> to vector<4x256xf32>
    %16 = arith.mulf %13, %15 : vector<4x256xf32>
    %17 = vector.extract_strided_slice %2 {offsets = [0, 4], sizes = [8, 4], strides = [1, 1]} : vector<8x36xf32> to vector<8x4xf32>
    %cst_7 = arith.constant dense<0.000000e+00> : vector<8x256xf32>
    %18 = tpu.matmul %17, %16, %cst_7 {dimension_numbers = #tpu.dot_dimension_numbers<[1], [0], [0], [1], [0, 0, 1, 1], [], []>} : vector<8x4xf32>, vector<4x256xf32>, vector<8x256xf32> -> vector<8x256xf32>
    %19 = arith.addf %12, %18 : vector<8x256xf32>
    %20 = vector.extract_strided_slice %6 {offsets = [0, 2], sizes = [4, 256], strides = [1, 1]} : vector<4x290xf32> to vector<4x256xf32>
    %c2 = arith.constant 2 : index
    %c0_8 = arith.constant 0 : index
    %21 = vector.load %arg3[%c2, %c0_8] : memref<27x256xf32, #tpu.memory_space<vmem>>, vector<1x256xf32>
    %22 = vector.broadcast %21 : vector<1x256xf32> to vector<4x256xf32>
    %23 = arith.mulf %20, %22 : vector<4x256xf32>
    %24 = vector.extract_strided_slice %2 {offsets = [0, 8], sizes = [8, 4], strides = [1, 1]} : vector<8x36xf32> to vector<8x4xf32>
    %cst_9 = arith.constant dense<0.000000e+00> : vector<8x256xf32>
    %25 = tpu.matmul %24, %23, %cst_9 {dimension_numbers = #tpu.dot_dimension_numbers<[1], [0], [0], [1], [0, 0, 1, 1], [], []>} : vector<8x4xf32>, vector<4x256xf32>, vector<8x256xf32> -> vector<8x256xf32>
    %26 = arith.addf %19, %25 : vector<8x256xf32>
    %27 = vector.extract_strided_slice %6 {offsets = [0, 16], sizes = [4, 256], strides = [1, 1]} : vector<4x290xf32> to vector<4x256xf32>
    %c3 = arith.constant 3 : index
    %c0_10 = arith.constant 0 : index
    %28 = vector.load %arg3[%c3, %c0_10] : memref<27x256xf32, #tpu.memory_space<vmem>>, vector<1x256xf32>
    %29 = vector.broadcast %28 : vector<1x256xf32> to vector<4x256xf32>
    %30 = arith.mulf %27, %29 : vector<4x256xf32>
    %31 = vector.extract_strided_slice %2 {offsets = [0, 12], sizes = [8, 4], strides = [1, 1]} : vector<8x36xf32> to vector<8x4xf32>
    %cst_11 = arith.constant dense<0.000000e+00> : vector<8x256xf32>
    %32 = tpu.matmul %31, %30, %cst_11 {dimension_numbers = #tpu.dot_dimension_numbers<[1], [0], [0], [1], [0, 0, 1, 1], [], []>} : vector<8x4xf32>, vector<4x256xf32>, vector<8x256xf32> -> vector<8x256xf32>
    %33 = arith.addf %26, %32 : vector<8x256xf32>
    %34 = vector.extract_strided_slice %6 {offsets = [0, 17], sizes = [4, 256], strides = [1, 1]} : vector<4x290xf32> to vector<4x256xf32>
    %35 = vector.extract_strided_slice %2 {offsets = [0, 16], sizes = [8, 4], strides = [1, 1]} : vector<8x36xf32> to vector<8x4xf32>
    %cst_12 = arith.constant dense<0.000000e+00> : vector<8x256xf32>
    %36 = tpu.matmul %35, %34, %cst_12 {dimension_numbers = #tpu.dot_dimension_numbers<[1], [0], [0], [1], [0, 0, 1, 1], [], []>} : vector<8x4xf32>, vector<4x256xf32>, vector<8x256xf32> -> vector<8x256xf32>
    %37 = arith.addf %33, %36 : vector<8x256xf32>
    %38 = vector.extract_strided_slice %6 {offsets = [0, 18], sizes = [4, 256], strides = [1, 1]} : vector<4x290xf32> to vector<4x256xf32>
    %c5 = arith.constant 5 : index
    %c0_13 = arith.constant 0 : index
    %39 = vector.load %arg3[%c5, %c0_13] : memref<27x256xf32, #tpu.memory_space<vmem>>, vector<1x256xf32>
    %40 = vector.broadcast %39 : vector<1x256xf32> to vector<4x256xf32>
    %41 = arith.mulf %38, %40 : vector<4x256xf32>
    %42 = vector.extract_strided_slice %2 {offsets = [0, 20], sizes = [8, 4], strides = [1, 1]} : vector<8x36xf32> to vector<8x4xf32>
    %cst_14 = arith.constant dense<0.000000e+00> : vector<8x256xf32>
    %43 = tpu.matmul %42, %41, %cst_14 {dimension_numbers = #tpu.dot_dimension_numbers<[1], [0], [0], [1], [0, 0, 1, 1], [], []>} : vector<8x4xf32>, vector<4x256xf32>, vector<8x256xf32> -> vector<8x256xf32>
    %44 = arith.addf %37, %43 : vector<8x256xf32>
    %45 = vector.extract_strided_slice %6 {offsets = [0, 32], sizes = [4, 256], strides = [1, 1]} : vector<4x290xf32> to vector<4x256xf32>
    %c6 = arith.constant 6 : index
    %c0_15 = arith.constant 0 : index
    %46 = vector.load %arg3[%c6, %c0_15] : memref<27x256xf32, #tpu.memory_space<vmem>>, vector<1x256xf32>
    %47 = vector.broadcast %46 : vector<1x256xf32> to vector<4x256xf32>
    %48 = arith.mulf %45, %47 : vector<4x256xf32>
    %49 = vector.extract_strided_slice %2 {offsets = [0, 24], sizes = [8, 4], strides = [1, 1]} : vector<8x36xf32> to vector<8x4xf32>
    %cst_16 = arith.constant dense<0.000000e+00> : vector<8x256xf32>
    %50 = tpu.matmul %49, %48, %cst_16 {dimension_numbers = #tpu.dot_dimension_numbers<[1], [0], [0], [1], [0, 0, 1, 1], [], []>} : vector<8x4xf32>, vector<4x256xf32>, vector<8x256xf32> -> vector<8x256xf32>
    %51 = arith.addf %44, %50 : vector<8x256xf32>
    %52 = vector.extract_strided_slice %6 {offsets = [0, 33], sizes = [4, 256], strides = [1, 1]} : vector<4x290xf32> to vector<4x256xf32>
    %c7 = arith.constant 7 : index
    %c0_17 = arith.constant 0 : index
    %53 = vector.load %arg3[%c7, %c0_17] : memref<27x256xf32, #tpu.memory_space<vmem>>, vector<1x256xf32>
    %54 = vector.broadcast %53 : vector<1x256xf32> to vector<4x256xf32>
    %55 = arith.mulf %52, %54 : vector<4x256xf32>
    %56 = vector.extract_strided_slice %2 {offsets = [0, 28], sizes = [8, 4], strides = [1, 1]} : vector<8x36xf32> to vector<8x4xf32>
    %cst_18 = arith.constant dense<0.000000e+00> : vector<8x256xf32>
    %57 = tpu.matmul %56, %55, %cst_18 {dimension_numbers = #tpu.dot_dimension_numbers<[1], [0], [0], [1], [0, 0, 1, 1], [], []>} : vector<8x4xf32>, vector<4x256xf32>, vector<8x256xf32> -> vector<8x256xf32>
    %58 = arith.addf %51, %57 : vector<8x256xf32>
    %59 = vector.extract_strided_slice %6 {offsets = [0, 34], sizes = [4, 256], strides = [1, 1]} : vector<4x290xf32> to vector<4x256xf32>
    %c8 = arith.constant 8 : index
    %c0_19 = arith.constant 0 : index
    %60 = vector.load %arg3[%c8, %c0_19] : memref<27x256xf32, #tpu.memory_space<vmem>>, vector<1x256xf32>
    %61 = vector.broadcast %60 : vector<1x256xf32> to vector<4x256xf32>
    %62 = arith.mulf %59, %61 : vector<4x256xf32>
    %63 = vector.extract_strided_slice %2 {offsets = [0, 32], sizes = [8, 4], strides = [1, 1]} : vector<8x36xf32> to vector<8x4xf32>
    %cst_20 = arith.constant dense<0.000000e+00> : vector<8x256xf32>
    %64 = tpu.matmul %63, %62, %cst_20 {dimension_numbers = #tpu.dot_dimension_numbers<[1], [0], [0], [1], [0, 0, 1, 1], [], []>} : vector<8x4xf32>, vector<4x256xf32>, vector<8x256xf32> -> vector<8x256xf32>
    %65 = arith.addf %58, %64 : vector<8x256xf32>
    %66 = vector.broadcast %3 : vector<8x1xf32> to vector<8x256xf32>
    %67 = arith.addf %65, %66 : vector<8x256xf32>
    %cst_21 = arith.constant 0.000000e+00 : f32
    %68 = vector.broadcast %cst_21 : f32 to vector<8x256xf32>
    %69 = arith.cmpf oge, %67, %68 : vector<8x256xf32>
    %cst_22 = arith.constant 1.000000e-01 : f32
    %70 = vector.broadcast %cst_22 : f32 to vector<8x256xf32>
    %71 = arith.mulf %70, %67 : vector<8x256xf32>
    %72 = arith.select %69, %67, %71 : vector<8x256xi1>, vector<8x256xf32>
    %73 = vector.broadcast %4 : vector<8x1xf32> to vector<8x256xf32>
    %74 = arith.addf %72, %73 : vector<8x256xf32>
    %c8_23 = arith.constant 8 : index
    %c0_24 = arith.constant 0 : index
    %75 = vector.load %arg2[%c8_23, %c0_24] : memref<72x146xf32, #tpu.memory_space<vmem>>, vector<16x146xf32>
    %76 = vector.extract_strided_slice %75 {offsets = [0, 0], sizes = [16, 72], strides = [1, 1]} : vector<16x146xf32> to vector<16x72xf32>
    %77 = vector.extract_strided_slice %75 {offsets = [0, 144], sizes = [16, 1], strides = [1, 1]} : vector<16x146xf32> to vector<16x1xf32>
    %78 = vector.extract_strided_slice %75 {offsets = [0, 145], sizes = [16, 1], strides = [1, 1]} : vector<16x146xf32> to vector<16x1xf32>
    %cst_25 = arith.constant 0.000000e+00 : f32
    %79 = vector.broadcast %cst_25 : f32 to vector<8x17xf32>
    %80 = tpu.concatenate %79, %74, %79 in 1 : vector<8x17xf32>, vector<8x256xf32>, vector<8x17xf32> -> vector<8x290xf32>
    %81 = vector.extract_strided_slice %80 {offsets = [0, 0], sizes = [8, 256], strides = [1, 1]} : vector<8x290xf32> to vector<8x256xf32>
    %c0_26 = arith.constant 0 : index
    %c0_27 = arith.constant 0 : index
    %82 = vector.load %arg3[%c0_26, %c0_27] : memref<27x256xf32, #tpu.memory_space<vmem>>, vector<1x256xf32>
    %83 = vector.broadcast %82 : vector<1x256xf32> to vector<8x256xf32>
    %84 = arith.mulf %81, %83 : vector<8x256xf32>
    %85 = vector.extract_strided_slice %76 {offsets = [0, 0], sizes = [16, 8], strides = [1, 1]} : vector<16x72xf32> to vector<16x8xf32>
    %cst_28 = arith.constant dense<0.000000e+00> : vector<16x256xf32>
    %86 = tpu.matmul %85, %84, %cst_28 {dimension_numbers = #tpu.dot_dimension_numbers<[1], [0], [0], [1], [0, 0, 1, 1], [], []>} : vector<16x8xf32>, vector<8x256xf32>, vector<16x256xf32> -> vector<16x256xf32>
    %87 = vector.extract_strided_slice %80 {offsets = [0, 1], sizes = [8, 256], strides = [1, 1]} : vector<8x290xf32> to vector<8x256xf32>
    %c1_29 = arith.constant 1 : index
    %c0_30 = arith.constant 0 : index
    %88 = vector.load %arg3[%c1_29, %c0_30] : memref<27x256xf32, #tpu.memory_space<vmem>>, vector<1x256xf32>
    %89 = vector.broadcast %88 : vector<1x256xf32> to vector<8x256xf32>
    %90 = arith.mulf %87, %89 : vector<8x256xf32>
    %91 = vector.extract_strided_slice %76 {offsets = [0, 8], sizes = [16, 8], strides = [1, 1]} : vector<16x72xf32> to vector<16x8xf32>
    %cst_31 = arith.constant dense<0.000000e+00> : vector<16x256xf32>
    %92 = tpu.matmul %91, %90, %cst_31 {dimension_numbers = #tpu.dot_dimension_numbers<[1], [0], [0], [1], [0, 0, 1, 1], [], []>} : vector<16x8xf32>, vector<8x256xf32>, vector<16x256xf32> -> vector<16x256xf32>
    %93 = arith.addf %86, %92 : vector<16x256xf32>
    %94 = vector.extract_strided_slice %80 {offsets = [0, 2], sizes = [8, 256], strides = [1, 1]} : vector<8x290xf32> to vector<8x256xf32>
    %c2_32 = arith.constant 2 : index
    %c0_33 = arith.constant 0 : index
    %95 = vector.load %arg3[%c2_32, %c0_33] : memref<27x256xf32, #tpu.memory_space<vmem>>, vector<1x256xf32>
    %96 = vector.broadcast %95 : vector<1x256xf32> to vector<8x256xf32>
    %97 = arith.mulf %94, %96 : vector<8x256xf32>
    %98 = vector.extract_strided_slice %76 {offsets = [0, 16], sizes = [16, 8], strides = [1, 1]} : vector<16x72xf32> to vector<16x8xf32>
    %cst_34 = arith.constant dense<0.000000e+00> : vector<16x256xf32>
    %99 = tpu.matmul %98, %97, %cst_34 {dimension_numbers = #tpu.dot_dimension_numbers<[1], [0], [0], [1], [0, 0, 1, 1], [], []>} : vector<16x8xf32>, vector<8x256xf32>, vector<16x256xf32> -> vector<16x256xf32>
    %100 = arith.addf %93, %99 : vector<16x256xf32>
    %101 = vector.extract_strided_slice %80 {offsets = [0, 16], sizes = [8, 256], strides = [1, 1]} : vector<8x290xf32> to vector<8x256xf32>
    %c3_35 = arith.constant 3 : index
    %c0_36 = arith.constant 0 : index
    %102 = vector.load %arg3[%c3_35, %c0_36] : memref<27x256xf32, #tpu.memory_space<vmem>>, vector<1x256xf32>
    %103 = vector.broadcast %102 : vector<1x256xf32> to vector<8x256xf32>
    %104 = arith.mulf %101, %103 : vector<8x256xf32>
    %105 = vector.extract_strided_slice %76 {offsets = [0, 24], sizes = [16, 8], strides = [1, 1]} : vector<16x72xf32> to vector<16x8xf32>
    %cst_37 = arith.constant dense<0.000000e+00> : vector<16x256xf32>
    %106 = tpu.matmul %105, %104, %cst_37 {dimension_numbers = #tpu.dot_dimension_numbers<[1], [0], [0], [1], [0, 0, 1, 1], [], []>} : vector<16x8xf32>, vector<8x256xf32>, vector<16x256xf32> -> vector<16x256xf32>
    %107 = arith.addf %100, %106 : vector<16x256xf32>
    %108 = vector.extract_strided_slice %80 {offsets = [0, 17], sizes = [8, 256], strides = [1, 1]} : vector<8x290xf32> to vector<8x256xf32>
    %109 = vector.extract_strided_slice %76 {offsets = [0, 32], sizes = [16, 8], strides = [1, 1]} : vector<16x72xf32> to vector<16x8xf32>
    %cst_38 = arith.constant dense<0.000000e+00> : vector<16x256xf32>
    %110 = tpu.matmul %109, %108, %cst_38 {dimension_numbers = #tpu.dot_dimension_numbers<[1], [0], [0], [1], [0, 0, 1, 1], [], []>} : vector<16x8xf32>, vector<8x256xf32>, vector<16x256xf32> -> vector<16x256xf32>
    %111 = arith.addf %107, %110 : vector<16x256xf32>
    %112 = vector.extract_strided_slice %80 {offsets = [0, 18], sizes = [8, 256], strides = [1, 1]} : vector<8x290xf32> to vector<8x256xf32>
    %c5_39 = arith.constant 5 : index
    %c0_40 = arith.constant 0 : index
    %113 = vector.load %arg3[%c5_39, %c0_40] : memref<27x256xf32, #tpu.memory_space<vmem>>, vector<1x256xf32>
    %114 = vector.broadcast %113 : vector<1x256xf32> to vector<8x256xf32>
    %115 = arith.mulf %112, %114 : vector<8x256xf32>
    %116 = vector.extract_strided_slice %76 {offsets = [0, 40], sizes = [16, 8], strides = [1, 1]} : vector<16x72xf32> to vector<16x8xf32>
    %cst_41 = arith.constant dense<0.000000e+00> : vector<16x256xf32>
    %117 = tpu.matmul %116, %115, %cst_41 {dimension_numbers = #tpu.dot_dimension_numbers<[1], [0], [0], [1], [0, 0, 1, 1], [], []>} : vector<16x8xf32>, vector<8x256xf32>, vector<16x256xf32> -> vector<16x256xf32>
    %118 = arith.addf %111, %117 : vector<16x256xf32>
    %119 = vector.extract_strided_slice %80 {offsets = [0, 32], sizes = [8, 256], strides = [1, 1]} : vector<8x290xf32> to vector<8x256xf32>
    %c6_42 = arith.constant 6 : index
    %c0_43 = arith.constant 0 : index
    %120 = vector.load %arg3[%c6_42, %c0_43] : memref<27x256xf32, #tpu.memory_space<vmem>>, vector<1x256xf32>
    %121 = vector.broadcast %120 : vector<1x256xf32> to vector<8x256xf32>
    %122 = arith.mulf %119, %121 : vector<8x256xf32>
    %123 = vector.extract_strided_slice %76 {offsets = [0, 48], sizes = [16, 8], strides = [1, 1]} : vector<16x72xf32> to vector<16x8xf32>
    %cst_44 = arith.constant dense<0.000000e+00> : vector<16x256xf32>
    %124 = tpu.matmul %123, %122, %cst_44 {dimension_numbers = #tpu.dot_dimension_numbers<[1], [0], [0], [1], [0, 0, 1, 1], [], []>} : vector<16x8xf32>, vector<8x256xf32>, vector<16x256xf32> -> vector<16x256xf32>
    %125 = arith.addf %118, %124 : vector<16x256xf32>
    %126 = vector.extract_strided_slice %80 {offsets = [0, 33], sizes = [8, 256], strides = [1, 1]} : vector<8x290xf32> to vector<8x256xf32>
    %c7_45 = arith.constant 7 : index
    %c0_46 = arith.constant 0 : index
    %127 = vector.load %arg3[%c7_45, %c0_46] : memref<27x256xf32, #tpu.memory_space<vmem>>, vector<1x256xf32>
    %128 = vector.broadcast %127 : vector<1x256xf32> to vector<8x256xf32>
    %129 = arith.mulf %126, %128 : vector<8x256xf32>
    %130 = vector.extract_strided_slice %76 {offsets = [0, 56], sizes = [16, 8], strides = [1, 1]} : vector<16x72xf32> to vector<16x8xf32>
    %cst_47 = arith.constant dense<0.000000e+00> : vector<16x256xf32>
    %131 = tpu.matmul %130, %129, %cst_47 {dimension_numbers = #tpu.dot_dimension_numbers<[1], [0], [0], [1], [0, 0, 1, 1], [], []>} : vector<16x8xf32>, vector<8x256xf32>, vector<16x256xf32> -> vector<16x256xf32>
    %132 = arith.addf %125, %131 : vector<16x256xf32>
    %133 = vector.extract_strided_slice %80 {offsets = [0, 34], sizes = [8, 256], strides = [1, 1]} : vector<8x290xf32> to vector<8x256xf32>
    %c8_48 = arith.constant 8 : index
    %c0_49 = arith.constant 0 : index
    %134 = vector.load %arg3[%c8_48, %c0_49] : memref<27x256xf32, #tpu.memory_space<vmem>>, vector<1x256xf32>
    %135 = vector.broadcast %134 : vector<1x256xf32> to vector<8x256xf32>
    %136 = arith.mulf %133, %135 : vector<8x256xf32>
    %137 = vector.extract_strided_slice %76 {offsets = [0, 64], sizes = [16, 8], strides = [1, 1]} : vector<16x72xf32> to vector<16x8xf32>
    %cst_50 = arith.constant dense<0.000000e+00> : vector<16x256xf32>
    %138 = tpu.matmul %137, %136, %cst_50 {dimension_numbers = #tpu.dot_dimension_numbers<[1], [0], [0], [1], [0, 0, 1, 1], [], []>} : vector<16x8xf32>, vector<8x256xf32>, vector<16x256xf32> -> vector<16x256xf32>
    %139 = arith.addf %132, %138 : vector<16x256xf32>
    %140 = vector.broadcast %77 : vector<16x1xf32> to vector<16x256xf32>
    %141 = arith.addf %139, %140 : vector<16x256xf32>
    %cst_51 = arith.constant 0.000000e+00 : f32
    %142 = vector.broadcast %cst_51 : f32 to vector<16x256xf32>
    %143 = arith.cmpf oge, %141, %142 : vector<16x256xf32>
    %cst_52 = arith.constant 1.000000e-01 : f32
    %144 = vector.broadcast %cst_52 : f32 to vector<16x256xf32>
    %145 = arith.mulf %144, %141 : vector<16x256xf32>
    %146 = arith.select %143, %141, %145 : vector<16x256xi1>, vector<16x256xf32>
    %147 = vector.broadcast %78 : vector<16x1xf32> to vector<16x256xf32>
    %148 = arith.addf %146, %147 : vector<16x256xf32>
    %cst_53 = arith.constant 0.000000e+00 : f32
    %149 = vector.broadcast %cst_53 : f32 to vector<16x17xf32>
    %150 = tpu.concatenate %149, %148, %149 in 1 : vector<16x17xf32>, vector<16x256xf32>, vector<16x17xf32> -> vector<16x290xf32>
    %151 = vector.extract_strided_slice %150 {offsets = [0, 0], sizes = [16, 256], strides = [1, 1]} : vector<16x290xf32> to vector<16x256xf32>
    %c9 = arith.constant 9 : index
    %c0_54 = arith.constant 0 : index
    %152 = vector.load %arg3[%c9, %c0_54] : memref<27x256xf32, #tpu.memory_space<vmem>>, vector<1x256xf32>
    %153 = vector.broadcast %152 : vector<1x256xf32> to vector<16x256xf32>
    %154 = arith.addf %151, %153 : vector<16x256xf32>
    %155 = vector.extract_strided_slice %150 {offsets = [0, 1], sizes = [16, 256], strides = [1, 1]} : vector<16x290xf32> to vector<16x256xf32>
    %c10 = arith.constant 10 : index
    %c0_55 = arith.constant 0 : index
    %156 = vector.load %arg3[%c10, %c0_55] : memref<27x256xf32, #tpu.memory_space<vmem>>, vector<1x256xf32>
    %157 = vector.broadcast %156 : vector<1x256xf32> to vector<16x256xf32>
    %158 = arith.addf %155, %157 : vector<16x256xf32>
    %159 = arith.maximumf %154, %158 : vector<16x256xf32>
    %160 = vector.extract_strided_slice %150 {offsets = [0, 2], sizes = [16, 256], strides = [1, 1]} : vector<16x290xf32> to vector<16x256xf32>
    %c11 = arith.constant 11 : index
    %c0_56 = arith.constant 0 : index
    %161 = vector.load %arg3[%c11, %c0_56] : memref<27x256xf32, #tpu.memory_space<vmem>>, vector<1x256xf32>
    %162 = vector.broadcast %161 : vector<1x256xf32> to vector<16x256xf32>
    %163 = arith.addf %160, %162 : vector<16x256xf32>
    %164 = arith.maximumf %159, %163 : vector<16x256xf32>
    %165 = vector.extract_strided_slice %150 {offsets = [0, 16], sizes = [16, 256], strides = [1, 1]} : vector<16x290xf32> to vector<16x256xf32>
    %c12 = arith.constant 12 : index
    %c0_57 = arith.constant 0 : index
    %166 = vector.load %arg3[%c12, %c0_57] : memref<27x256xf32, #tpu.memory_space<vmem>>, vector<1x256xf32>
    %167 = vector.broadcast %166 : vector<1x256xf32> to vector<16x256xf32>
    %168 = arith.addf %165, %167 : vector<16x256xf32>
    %169 = arith.maximumf %164, %168 : vector<16x256xf32>
    %170 = vector.extract_strided_slice %150 {offsets = [0, 17], sizes = [16, 256], strides = [1, 1]} : vector<16x290xf32> to vector<16x256xf32>
    %171 = arith.maximumf %169, %170 : vector<16x256xf32>
    %172 = vector.extract_strided_slice %150 {offsets = [0, 18], sizes = [16, 256], strides = [1, 1]} : vector<16x290xf32> to vector<16x256xf32>
    %c14 = arith.constant 14 : index
    %c0_58 = arith.constant 0 : index
    %173 = vector.load %arg3[%c14, %c0_58] : memref<27x256xf32, #tpu.memory_space<vmem>>, vector<1x256xf32>
    %174 = vector.broadcast %173 : vector<1x256xf32> to vector<16x256xf32>
    %175 = arith.addf %172, %174 : vector<16x256xf32>
    %176 = arith.maximumf %171, %175 : vector<16x256xf32>
    %177 = vector.extract_strided_slice %150 {offsets = [0, 32], sizes = [16, 256], strides = [1, 1]} : vector<16x290xf32> to vector<16x256xf32>
    %c15 = arith.constant 15 : index
    %c0_59 = arith.constant 0 : index
    %178 = vector.load %arg3[%c15, %c0_59] : memref<27x256xf32, #tpu.memory_space<vmem>>, vector<1x256xf32>
    %179 = vector.broadcast %178 : vector<1x256xf32> to vector<16x256xf32>
    %180 = arith.addf %177, %179 : vector<16x256xf32>
    %181 = arith.maximumf %176, %180 : vector<16x256xf32>
    %182 = vector.extract_strided_slice %150 {offsets = [0, 33], sizes = [16, 256], strides = [1, 1]} : vector<16x290xf32> to vector<16x256xf32>
    %c16 = arith.constant 16 : index
    %c0_60 = arith.constant 0 : index
    %183 = vector.load %arg3[%c16, %c0_60] : memref<27x256xf32, #tpu.memory_space<vmem>>, vector<1x256xf32>
    %184 = vector.broadcast %183 : vector<1x256xf32> to vector<16x256xf32>
    %185 = arith.addf %182, %184 : vector<16x256xf32>
    %186 = arith.maximumf %181, %185 : vector<16x256xf32>
    %187 = vector.extract_strided_slice %150 {offsets = [0, 34], sizes = [16, 256], strides = [1, 1]} : vector<16x290xf32> to vector<16x256xf32>
    %c17 = arith.constant 17 : index
    %c0_61 = arith.constant 0 : index
    %188 = vector.load %arg3[%c17, %c0_61] : memref<27x256xf32, #tpu.memory_space<vmem>>, vector<1x256xf32>
    %189 = vector.broadcast %188 : vector<1x256xf32> to vector<16x256xf32>
    %190 = arith.addf %187, %189 : vector<16x256xf32>
    %191 = arith.maximumf %186, %190 : vector<16x256xf32>
    %c0_62 = arith.constant 0 : index
    %c0_63 = arith.constant 0 : index
    %192 = vector.load %arg4[%c0_62, %c0_63] : memref<256x64xf32, #tpu.memory_space<vmem>>, vector<256x64xf32>
    %cst_64 = arith.constant dense<0.000000e+00> : vector<16x64xf32>
    %193 = tpu.matmul %191, %192, %cst_64 {dimension_numbers = #tpu.dot_dimension_numbers<[1], [0], [0], [1], [0, 0, 1, 1], [], []>} : vector<16x256xf32>, vector<256x64xf32>, vector<16x64xf32> -> vector<16x64xf32>
    %c24 = arith.constant 24 : index
    %c0_65 = arith.constant 0 : index
    %194 = vector.load %arg2[%c24, %c0_65] : memref<72x146xf32, #tpu.memory_space<vmem>>, vector<16x146xf32>
    %195 = vector.extract_strided_slice %194 {offsets = [0, 0], sizes = [16, 144], strides = [1, 1]} : vector<16x146xf32> to vector<16x144xf32>
    %196 = vector.extract_strided_slice %194 {offsets = [0, 144], sizes = [16, 1], strides = [1, 1]} : vector<16x146xf32> to vector<16x1xf32>
    %197 = vector.extract_strided_slice %194 {offsets = [0, 145], sizes = [16, 1], strides = [1, 1]} : vector<16x146xf32> to vector<16x1xf32>
    %cst_66 = arith.constant 0.000000e+00 : f32
    %198 = vector.broadcast %cst_66 : f32 to vector<16x9xf32>
    %199 = tpu.concatenate %198, %193, %198 in 1 : vector<16x9xf32>, vector<16x64xf32>, vector<16x9xf32> -> vector<16x82xf32>
    %200 = vector.extract_strided_slice %199 {offsets = [0, 0], sizes = [16, 64], strides = [1, 1]} : vector<16x82xf32> to vector<16x64xf32>
    %c18 = arith.constant 18 : index
    %c0_67 = arith.constant 0 : index
    %201 = vector.load %arg3[%c18, %c0_67] : memref<27x256xf32, #tpu.memory_space<vmem>>, vector<1x64xf32>
    %202 = vector.broadcast %201 : vector<1x64xf32> to vector<16x64xf32>
    %203 = arith.mulf %200, %202 : vector<16x64xf32>
    %204 = vector.extract_strided_slice %195 {offsets = [0, 0], sizes = [16, 16], strides = [1, 1]} : vector<16x144xf32> to vector<16x16xf32>
    %cst_68 = arith.constant dense<0.000000e+00> : vector<16x64xf32>
    %205 = tpu.matmul %204, %203, %cst_68 {dimension_numbers = #tpu.dot_dimension_numbers<[1], [0], [0], [1], [0, 0, 1, 1], [], []>} : vector<16x16xf32>, vector<16x64xf32>, vector<16x64xf32> -> vector<16x64xf32>
    %206 = vector.extract_strided_slice %199 {offsets = [0, 1], sizes = [16, 64], strides = [1, 1]} : vector<16x82xf32> to vector<16x64xf32>
    %c19 = arith.constant 19 : index
    %c0_69 = arith.constant 0 : index
    %207 = vector.load %arg3[%c19, %c0_69] : memref<27x256xf32, #tpu.memory_space<vmem>>, vector<1x64xf32>
    %208 = vector.broadcast %207 : vector<1x64xf32> to vector<16x64xf32>
    %209 = arith.mulf %206, %208 : vector<16x64xf32>
    %210 = vector.extract_strided_slice %195 {offsets = [0, 16], sizes = [16, 16], strides = [1, 1]} : vector<16x144xf32> to vector<16x16xf32>
    %cst_70 = arith.constant dense<0.000000e+00> : vector<16x64xf32>
    %211 = tpu.matmul %210, %209, %cst_70 {dimension_numbers = #tpu.dot_dimension_numbers<[1], [0], [0], [1], [0, 0, 1, 1], [], []>} : vector<16x16xf32>, vector<16x64xf32>, vector<16x64xf32> -> vector<16x64xf32>
    %212 = arith.addf %205, %211 : vector<16x64xf32>
    %213 = vector.extract_strided_slice %199 {offsets = [0, 2], sizes = [16, 64], strides = [1, 1]} : vector<16x82xf32> to vector<16x64xf32>
    %c20 = arith.constant 20 : index
    %c0_71 = arith.constant 0 : index
    %214 = vector.load %arg3[%c20, %c0_71] : memref<27x256xf32, #tpu.memory_space<vmem>>, vector<1x64xf32>
    %215 = vector.broadcast %214 : vector<1x64xf32> to vector<16x64xf32>
    %216 = arith.mulf %213, %215 : vector<16x64xf32>
    %217 = vector.extract_strided_slice %195 {offsets = [0, 32], sizes = [16, 16], strides = [1, 1]} : vector<16x144xf32> to vector<16x16xf32>
    %cst_72 = arith.constant dense<0.000000e+00> : vector<16x64xf32>
    %218 = tpu.matmul %217, %216, %cst_72 {dimension_numbers = #tpu.dot_dimension_numbers<[1], [0], [0], [1], [0, 0, 1, 1], [], []>} : vector<16x16xf32>, vector<16x64xf32>, vector<16x64xf32> -> vector<16x64xf32>
    %219 = arith.addf %212, %218 : vector<16x64xf32>
    %220 = vector.extract_strided_slice %199 {offsets = [0, 8], sizes = [16, 64], strides = [1, 1]} : vector<16x82xf32> to vector<16x64xf32>
    %c21 = arith.constant 21 : index
    %c0_73 = arith.constant 0 : index
    %221 = vector.load %arg3[%c21, %c0_73] : memref<27x256xf32, #tpu.memory_space<vmem>>, vector<1x64xf32>
    %222 = vector.broadcast %221 : vector<1x64xf32> to vector<16x64xf32>
    %223 = arith.mulf %220, %222 : vector<16x64xf32>
    %224 = vector.extract_strided_slice %195 {offsets = [0, 48], sizes = [16, 16], strides = [1, 1]} : vector<16x144xf32> to vector<16x16xf32>
    %cst_74 = arith.constant dense<0.000000e+00> : vector<16x64xf32>
    %225 = tpu.matmul %224, %223, %cst_74 {dimension_numbers = #tpu.dot_dimension_numbers<[1], [0], [0], [1], [0, 0, 1, 1], [], []>} : vector<16x16xf32>, vector<16x64xf32>, vector<16x64xf32> -> vector<16x64xf32>
    %226 = arith.addf %219, %225 : vector<16x64xf32>
    %227 = vector.extract_strided_slice %199 {offsets = [0, 9], sizes = [16, 64], strides = [1, 1]} : vector<16x82xf32> to vector<16x64xf32>
    %228 = vector.extract_strided_slice %195 {offsets = [0, 64], sizes = [16, 16], strides = [1, 1]} : vector<16x144xf32> to vector<16x16xf32>
    %cst_75 = arith.constant dense<0.000000e+00> : vector<16x64xf32>
    %229 = tpu.matmul %228, %227, %cst_75 {dimension_numbers = #tpu.dot_dimension_numbers<[1], [0], [0], [1], [0, 0, 1, 1], [], []>} : vector<16x16xf32>, vector<16x64xf32>, vector<16x64xf32> -> vector<16x64xf32>
    %230 = arith.addf %226, %229 : vector<16x64xf32>
    %231 = vector.extract_strided_slice %199 {offsets = [0, 10], sizes = [16, 64], strides = [1, 1]} : vector<16x82xf32> to vector<16x64xf32>
    %c23 = arith.constant 23 : index
    %c0_76 = arith.constant 0 : index
    %232 = vector.load %arg3[%c23, %c0_76] : memref<27x256xf32, #tpu.memory_space<vmem>>, vector<1x64xf32>
    %233 = vector.broadcast %232 : vector<1x64xf32> to vector<16x64xf32>
    %234 = arith.mulf %231, %233 : vector<16x64xf32>
    %235 = vector.extract_strided_slice %195 {offsets = [0, 80], sizes = [16, 16], strides = [1, 1]} : vector<16x144xf32> to vector<16x16xf32>
    %cst_77 = arith.constant dense<0.000000e+00> : vector<16x64xf32>
    %236 = tpu.matmul %235, %234, %cst_77 {dimension_numbers = #tpu.dot_dimension_numbers<[1], [0], [0], [1], [0, 0, 1, 1], [], []>} : vector<16x16xf32>, vector<16x64xf32>, vector<16x64xf32> -> vector<16x64xf32>
    %237 = arith.addf %230, %236 : vector<16x64xf32>
    %238 = vector.extract_strided_slice %199 {offsets = [0, 16], sizes = [16, 64], strides = [1, 1]} : vector<16x82xf32> to vector<16x64xf32>
    %c24_78 = arith.constant 24 : index
    %c0_79 = arith.constant 0 : index
    %239 = vector.load %arg3[%c24_78, %c0_79] : memref<27x256xf32, #tpu.memory_space<vmem>>, vector<1x64xf32>
    %240 = vector.broadcast %239 : vector<1x64xf32> to vector<16x64xf32>
    %241 = arith.mulf %238, %240 : vector<16x64xf32>
    %242 = vector.extract_strided_slice %195 {offsets = [0, 96], sizes = [16, 16], strides = [1, 1]} : vector<16x144xf32> to vector<16x16xf32>
    %cst_80 = arith.constant dense<0.000000e+00> : vector<16x64xf32>
    %243 = tpu.matmul %242, %241, %cst_80 {dimension_numbers = #tpu.dot_dimension_numbers<[1], [0], [0], [1], [0, 0, 1, 1], [], []>} : vector<16x16xf32>, vector<16x64xf32>, vector<16x64xf32> -> vector<16x64xf32>
    %244 = arith.addf %237, %243 : vector<16x64xf32>
    %245 = vector.extract_strided_slice %199 {offsets = [0, 17], sizes = [16, 64], strides = [1, 1]} : vector<16x82xf32> to vector<16x64xf32>
    %c25 = arith.constant 25 : index
    %c0_81 = arith.constant 0 : index
    %246 = vector.load %arg3[%c25, %c0_81] : memref<27x256xf32, #tpu.memory_space<vmem>>, vector<1x64xf32>
    %247 = vector.broadcast %246 : vector<1x64xf32> to vector<16x64xf32>
    %248 = arith.mulf %245, %247 : vector<16x64xf32>
    %249 = vector.extract_strided_slice %195 {offsets = [0, 112], sizes = [16, 16], strides = [1, 1]} : vector<16x144xf32> to vector<16x16xf32>
    %cst_82 = arith.constant dense<0.000000e+00> : vector<16x64xf32>
    %250 = tpu.matmul %249, %248, %cst_82 {dimension_numbers = #tpu.dot_dimension_numbers<[1], [0], [0], [1], [0, 0, 1, 1], [], []>} : vector<16x16xf32>, vector<16x64xf32>, vector<16x64xf32> -> vector<16x64xf32>
    %251 = arith.addf %244, %250 : vector<16x64xf32>
    %252 = vector.extract_strided_slice %199 {offsets = [0, 18], sizes = [16, 64], strides = [1, 1]} : vector<16x82xf32> to vector<16x64xf32>
    %c26 = arith.constant 26 : index
    %c0_83 = arith.constant 0 : index
    %253 = vector.load %arg3[%c26, %c0_83] : memref<27x256xf32, #tpu.memory_space<vmem>>, vector<1x64xf32>
    %254 = vector.broadcast %253 : vector<1x64xf32> to vector<16x64xf32>
    %255 = arith.mulf %252, %254 : vector<16x64xf32>
    %256 = vector.extract_strided_slice %195 {offsets = [0, 128], sizes = [16, 16], strides = [1, 1]} : vector<16x144xf32> to vector<16x16xf32>
    %cst_84 = arith.constant dense<0.000000e+00> : vector<16x64xf32>
    %257 = tpu.matmul %256, %255, %cst_84 {dimension_numbers = #tpu.dot_dimension_numbers<[1], [0], [0], [1], [0, 0, 1, 1], [], []>} : vector<16x16xf32>, vector<16x64xf32>, vector<16x64xf32> -> vector<16x64xf32>
    %258 = arith.addf %251, %257 : vector<16x64xf32>
    %259 = vector.broadcast %196 : vector<16x1xf32> to vector<16x64xf32>
    %260 = arith.addf %258, %259 : vector<16x64xf32>
    %cst_85 = arith.constant 0.000000e+00 : f32
    %261 = vector.broadcast %cst_85 : f32 to vector<16x64xf32>
    %262 = arith.cmpf oge, %260, %261 : vector<16x64xf32>
    %cst_86 = arith.constant 1.000000e-01 : f32
    %263 = vector.broadcast %cst_86 : f32 to vector<16x64xf32>
    %264 = arith.mulf %263, %260 : vector<16x64xf32>
    %265 = arith.select %262, %260, %264 : vector<16x64xi1>, vector<16x64xf32>
    %266 = vector.broadcast %197 : vector<16x1xf32> to vector<16x64xf32>
    %267 = arith.addf %265, %266 : vector<16x64xf32>
    %c40 = arith.constant 40 : index
    %c0_87 = arith.constant 0 : index
    %268 = vector.load %arg2[%c40, %c0_87] : memref<72x146xf32, #tpu.memory_space<vmem>>, vector<16x146xf32>
    %269 = vector.extract_strided_slice %268 {offsets = [0, 0], sizes = [16, 16], strides = [1, 1]} : vector<16x146xf32> to vector<16x16xf32>
    %270 = vector.extract_strided_slice %268 {offsets = [0, 144], sizes = [16, 1], strides = [1, 1]} : vector<16x146xf32> to vector<16x1xf32>
    %271 = vector.extract_strided_slice %268 {offsets = [0, 145], sizes = [16, 1], strides = [1, 1]} : vector<16x146xf32> to vector<16x1xf32>
    %cst_88 = arith.constant dense<0.000000e+00> : vector<16x64xf32>
    %272 = tpu.matmul %269, %267, %cst_88 {dimension_numbers = #tpu.dot_dimension_numbers<[1], [0], [0], [1], [0, 0, 1, 1], [], []>} : vector<16x16xf32>, vector<16x64xf32>, vector<16x64xf32> -> vector<16x64xf32>
    %273 = vector.broadcast %270 : vector<16x1xf32> to vector<16x64xf32>
    %274 = arith.addf %272, %273 : vector<16x64xf32>
    %cst_89 = arith.constant 0.000000e+00 : f32
    %275 = vector.broadcast %cst_89 : f32 to vector<16x64xf32>
    %276 = arith.cmpf oge, %274, %275 : vector<16x64xf32>
    %cst_90 = arith.constant 1.000000e-01 : f32
    %277 = vector.broadcast %cst_90 : f32 to vector<16x64xf32>
    %278 = arith.mulf %277, %274 : vector<16x64xf32>
    %279 = arith.select %276, %274, %278 : vector<16x64xi1>, vector<16x64xf32>
    %280 = vector.broadcast %271 : vector<16x1xf32> to vector<16x64xf32>
    %281 = arith.addf %279, %280 : vector<16x64xf32>
    %c56 = arith.constant 56 : index
    %c0_91 = arith.constant 0 : index
    %282 = vector.load %arg2[%c56, %c0_91] : memref<72x146xf32, #tpu.memory_space<vmem>>, vector<16x146xf32>
    %283 = vector.extract_strided_slice %282 {offsets = [0, 0], sizes = [16, 16], strides = [1, 1]} : vector<16x146xf32> to vector<16x16xf32>
    %284 = vector.extract_strided_slice %282 {offsets = [0, 144], sizes = [16, 1], strides = [1, 1]} : vector<16x146xf32> to vector<16x1xf32>
    %285 = vector.extract_strided_slice %282 {offsets = [0, 145], sizes = [16, 1], strides = [1, 1]} : vector<16x146xf32> to vector<16x1xf32>
    %cst_92 = arith.constant dense<0.000000e+00> : vector<16x64xf32>
    %286 = tpu.matmul %283, %281, %cst_92 {dimension_numbers = #tpu.dot_dimension_numbers<[1], [0], [0], [1], [0, 0, 1, 1], [], []>} : vector<16x16xf32>, vector<16x64xf32>, vector<16x64xf32> -> vector<16x64xf32>
    %287 = vector.broadcast %284 : vector<16x1xf32> to vector<16x64xf32>
    %288 = arith.addf %286, %287 : vector<16x64xf32>
    %cst_93 = arith.constant 0.000000e+00 : f32
    %289 = vector.broadcast %cst_93 : f32 to vector<16x64xf32>
    %290 = arith.cmpf oge, %288, %289 : vector<16x64xf32>
    %cst_94 = arith.constant 1.000000e-01 : f32
    %291 = vector.broadcast %cst_94 : f32 to vector<16x64xf32>
    %292 = arith.mulf %291, %288 : vector<16x64xf32>
    %293 = arith.select %290, %288, %292 : vector<16x64xi1>, vector<16x64xf32>
    %294 = vector.broadcast %285 : vector<16x1xf32> to vector<16x64xf32>
    %295 = arith.addf %293, %294 : vector<16x64xf32>
    %c0_95 = arith.constant 0 : index
    %c0_96 = arith.constant 0 : index
    %296 = vector.load %arg5[%c0_95, %c0_96] : memref<64x1xf32, #tpu.memory_space<vmem>>, vector<64x1xf32>
    %cst_97 = arith.constant dense<0.000000e+00> : vector<16x1xf32>
    %297 = tpu.matmul %295, %296, %cst_97 {dimension_numbers = #tpu.dot_dimension_numbers<[1], [0], [0], [1], [0, 0, 1, 1], [], []>} : vector<16x64xf32>, vector<64x1xf32>, vector<16x1xf32> -> vector<16x1xf32>
    %c0_98 = arith.constant 0 : index
    %c0_99 = arith.constant 0 : index
    %c0_100 = arith.constant 0 : index
    %298 = vector.load %arg6[%c0_98, %c0_99, %c0_100] : memref<1x16x1xf32, #tpu.memory_space<vmem>>, vector<1x16x1xf32>
    %299 = vector.shape_cast %298 : vector<1x16x1xf32> to vector<16x1xf32>
    %300 = vector.shape_cast %297 : vector<16x1xf32> to vector<1x16x1xf32>
    tpu.vector_store %arg6[%c0_98, %c0_99, %c0_100], %300 {strides = array<i32>} : memref<1x16x1xf32, #tpu.memory_space<vmem>>, vector<1x16x1xf32>,
    return
  }
  func.func @transform_0(%arg0: i32) -> (i32, i32) {
    %c0_i32 = arith.constant 0 : i32
    %c0_i32_0 = arith.constant 0 : i32
    return %c0_i32, %arg0 : i32, i32
  }
  func.func @transform_1(%arg0: i32) -> (i32, i32) {
    %c0_i32 = arith.constant 0 : i32
    %c0_i32_0 = arith.constant 0 : i32
    %c0_i32_1 = arith.constant 0 : i32
    return %c0_i32, %c0_i32_0 : i32, i32
  }
  func.func @transform_2(%arg0: i32) -> (i32, i32) {
    %c0_i32 = arith.constant 0 : i32
    %c0_i32_0 = arith.constant 0 : i32
    %c0_i32_1 = arith.constant 0 : i32
    return %c0_i32, %c0_i32_0 : i32, i32
  }
  func.func @transform_3(%arg0: i32) -> (i32, i32) {
    %c0_i32 = arith.constant 0 : i32
    %c0_i32_0 = arith.constant 0 : i32
    %c0_i32_1 = arith.constant 0 : i32
    return %c0_i32, %c0_i32_0 : i32, i32
  }
  func.func @transform_4(%arg0: i32) -> (i32, i32) {
    %c0_i32 = arith.constant 0 : i32
    %c0_i32_0 = arith.constant 0 : i32
    %c0_i32_1 = arith.constant 0 : i32
    return %c0_i32, %c0_i32_0 : i32, i32
  }
  func.func @transform_5(%arg0: i32) -> (i32, i32, i32) {
    %c0_i32 = arith.constant 0 : i32
    %c0_i32_0 = arith.constant 0 : i32
    %c0_i32_1 = arith.constant 0 : i32
    return %arg0, %c0_i32, %c0_i32_0 : i32, i32, i32
  }
}

</mosaic_0001>

<bundles_post_ra>
// kernel: tpu_custom_call.1
= control target key start
LH: loop header
LB: loop body
LE: loop exit
PB: predicated region body
PF: predicated region fallthrough
CT: control target
= control target key end

     0   :  { %s4811_s18 = smov 0   ;;  %s5890_s0 = inlined_call_operand.vmem [shape: f32[4,512], index: 0, kind: input, shape index: {}]   ;;  %s5891_s1 = inlined_call_operand.vmem [shape: f32[72,146], index: 1, kind: input, shape index: {}]   ;;  %s5892_s2 = inlined_call_operand.vmem [shape: f32[27,256], index: 2, kind: input, shape index: {}]   ;;  %s5893_s3 = inlined_call_operand.vmem [shape: f32[256,64], index: 3, kind: input, shape index: {}]   ;;  %s5894_s4 = inlined_call_operand.vmem [shape: f32[64,1], index: 4, kind: input, shape index: {}]   ;;  %s5895_s5 = inlined_call_operand.vmem [shape: f32[2,16,1], index: 5, kind: output, shape index: {}]  }
   0x1 LB: > { %s4817_s19 = sadd.s32 4294967295, %s4744_s18   ;;  %p4083_p0 = scmp.ge.s32.totalorder %s4744_s18, 1  ;;  %s4744_s18 = sphi %s4811_s18, %s15_s18  }
   0x2   : > { %p188_p1 = scmp.lt.s32.totalorder %s4744_s18, 3 }
   0x4   : > { %p189_p2 = pnand %p4083_p0, %p188_p1 }
   0x5   : > { %v245_v0 = vlaneseq (!%p189_p2)  ;;  %s4084_s20 = sshll.u32 (!%p189_p2), %s4817_s19, 1  ;;  %v4095_v2 = vld [vmem:[%s5892_s2 + $0x2] ss:$8 sm:$0x3] (!%p189_p2)  ;;  %s4746_s27 = smov (!%p189_p2), 2   ;;  %v4756_v28 = vmov (!%p189_p2), 0.0  }
   0x6   : > { %192 = sbr.rel (%p189_p2) target bundleno = 2761 (0xac9), region = 40  ;;  %p217_p3 = scmp.lt.s32.totalorder (!%p189_p2), %s4084_s20, 3  ;;  %v4099_v9 = vld [vmem:[%s5892_s2 + $0x3] ss:$8 sm:$0x3] (!%p189_p2)  ;;  %446 = vmatprep.mubr.f32.mxu0 (!%p189_p2), %v4756_v28  ;;  %367 = vmatprep.mubr.f32.mxu1 (!%p189_p2), %v4756_v28  ;;  %vm236_vm0 = vcmask (!%p189_p2), 138240  }
   0x7   : > { %v246_v1 = vshrl.u32 (!%p189_p2), %v245_v0, 7  ;;  %s4747_s28 = smov (!%p189_p2), 17   ;;  %v4106_v12 = vld [vmem:[%s5892_s2 + $0x5] ss:$8 sm:$0x3] (!%p189_p2)  ;;  %s4748_s8 = smov (!%p189_p2), 16  }
   0x8   : > { %v4110_v15 = vld [vmem:[%s5892_s2 + $0x6] ss:$8 sm:$0x3] (!%p189_p2)  ;;  %s4749_s11 = smov (!%p189_p2), 18   ;;  %s4750_s14 = smov (!%p189_p2), 32   ;;  %vm298_vm1 = vcmask (!%p189_p2), 1043456  }
   0x9   : > { %v4825_v3 = vsub.s32 (!%p189_p2), 0, %v246_v1  ;;  %v4827_v4 = vsub.s32 (!%p189_p2), 1, %v246_v1  ;;  %v4114_v18 = vld [vmem:[%s5892_s2 + $0x7] ss:$8 sm:$0x3] (!%p189_p2)  ;;  %s4751_s17 = smov (!%p189_p2), 33  }
   0xa   : > { %v4088_v21 = vld [vmem:[%s5892_s2 + $0x1] ss:$8 sm:$0x3] (!%p189_p2)  ;;  %v4118_v24 = vld [vmem:[%s5892_s2 + $0x10] ss:$8 sm:$0x3] (!%p189_p2) }
   0xb   : > { %v459_v5 = vrot.slane (!%p189_p2), %v4095_v2, %v4825_v3  ;;  %v463_v7 = vrot.slane (!%p189_p2), %v4095_v2, %v4827_v4  ;;  %v579_v10 = vrot.slane (!%p189_p2), %v4099_v9, %v4827_v4  ;;  %v575_v11 = vrot.slane (!%p189_p2), %v4099_v9, %v4825_v3  ;;  %s4752_s22 = smov (!%p189_p2), 1   ;;  %v4883_v27 = vld [vmem:[%s5891_s1] sm:$0xff] (!%p189_p2)  ;;  %s4755_s29 = smov (!%p189_p2), 116  }
   0xc   : > { %v787_v13 = vrot.slane (!%p189_p2), %v4106_v12, %v4827_v4  ;;  %v783_v14 = vrot.slane (!%p189_p2), %v4106_v12, %v4825_v3  ;;  %v903_v16 = vrot.slane (!%p189_p2), %v4110_v15, %v4827_v4  ;;  %v899_v17 = vrot.slane (!%p189_p2), %v4110_v15, %v4825_v3  ;;  %v243_v31 = vld [vmem:[%s5892_s2] ss:$8 sm:$0x3] (!%p189_p2)  ;;  %s4757_s7 = smov (!%p189_p2), 126   ;;  %s4758_s9 = smov (!%p189_p2), 112  }
   0xd   : > { %s5913_s20 = smov (!%p217_p3, %s4084_s20), 3  ;;  %464 = vrot.lane.b32.xlu1 %v459_v5, %s4746_s27  ;;  %v1019_v19 = vrot.slane %v4114_v18, %v4827_v4  ;;  %v1015_v20 = vrot.slane %v4114_v18, %v4825_v3  ;;  %v267_v22 = vrot.slane %v4088_v21, %v4827_v4  ;;  %v263_v23 = vrot.slane %v4088_v21, %v4825_v3  ;;  %s4759_s10 = smov 111   ;;  %v229_v21 = vld [vmem:[%s5891_s1 + $0x8] sm:$0xff] }
   0xe   : > { %s4085_s23 = sshll.u32 %s5913_s20, 2  ;;  %v1135_v25 = vrot.slane %v4118_v24, %v4827_v4  ;;  %v1131_v26 = vrot.slane %v4118_v24, %v4825_v3  ;;  %v4901_v34 = vrot.slane %v243_v31, %v4827_v4  ;;  %v4904_v35 = vrot.slane %v243_v31, %v4825_v3  ;;  %s4760_s12 = smov 108  }
   0xf   : > { %s220_s26 = scalar_lea.vmem %s5890_s0, %s4085_s23  ;;  %s4753_s23 = smov 34   ;;  %vm468_vm2 = vcmask 15360   ;;  %vm295_vm3 = vcmask 31744   ;;  %vm584_vm4 = vcmask 130048   ;;  %vm792_vm5 = vcmask 146432  }
  0x10   : > { %v227_v6 = vld [vmem:[%s220_s26] sm:$0xff]  ;;  %s5901_s26 = smov 120   ;;  %s4761_s13 = smov 104   ;;  %vm5898_vm6 = vcmask 261120   ;;  %vm5897_vm7 = vcmask 269312   ;;  %vm272_vm8 = vcmask 7168  }
  0x11   : > { %232 = vrot.lane.b32.xlu0 %v227_v6, %s4747_s28  ;;  %v231_v8 = vcombine.high %v227_v6, %v227_v6  ;;  %466 = vrot.lane.b32.xlu1 %v463_v7, %s4746_s27  ;;  %s4762_s15 = smov 110   ;;  %s4763_s16 = smov 96   ;;  %vm5896_vm9 = vcmask 277504   ;;  %vm487_vm10 = vcmask 1031168   ;;  %vm603_vm11 = vcmask 916480  }
  0x12   : > { %s4764_s20 = smov 100   ;;  %s4765_s21 = smov 95   ;;  %vm695_vm12 = vcmask 908288   ;;  %vm811_vm13 = vcmask 900096   ;;  %vm927_vm14 = vcmask 785408   ;;  %vm1043_vm15 = vcmask 777216  }
  0x13   : > { %s4766_s24 = smov 94   ;;  %s4767_s25 = smov 127  }
  0x14   : > { %s4770_s6 = smov 124   ;;  %p222_p4 = scmp.lt.s32.totalorder %s4817_s19, 1 }
  0x15   : > { %234 = vrot.lane.b32.xlu0 %v231_v8, %s4747_s28  ;;  %582 = vrot.lane.b32.xlu1 %v579_v10, %s4748_s8 }
  0x16   : > { %s5915_s19 = smov (!%p222_p4, %s4817_s19), 1 }
  0x19   : > { %580 = vrot.lane.b32.xlu0 %v575_v11, %s4748_s8  ;;  %790 = vrot.lane.b32.xlu1 %v787_v13, %s4749_s11 }
  0x1d   : > { %788 = vrot.lane.b32.xlu0 %v783_v14, %s4749_s11  ;;  %906 = vrot.lane.b32.xlu1 %v903_v16, %s4750_s14  ;;  %v4768_v16 = vmov 17  }
  0x1e   : > { %4563 = vset.pattern.permute.xlu1 %v4768_v16 }
  0x21   : > { %904 = vrot.lane.b32.xlu0 %v899_v17, %s4750_s14  ;;  %1022 = vrot.lane.b32.xlu1 %v1019_v19, %s4751_s17  ;;  %v4769_v17 = vmov 16  }
  0x22   : > { %4562 = vset.pattern.permute.xlu0 %v4769_v17 }
  0x25   : > { %1020 = vrot.lane.b32.xlu0 %v1015_v20, %s4751_s17  ;;  %270 = vrot.lane.b32.xlu1 %v267_v22, %s4752_s22 }
  0x29   : > { %268 = vrot.lane.b32.xlu0 %v263_v23, %s4752_s22  ;;  %1138 = vrot.lane.b32.xlu1 %v1135_v25, %s4753_s23 }
  0x2d   : > { %1136 = vrot.lane.b32.xlu0 %v1131_v26, %s4753_s23  ;;  %476 = vrot.lane.b32.xlu1 %v4883_v27, %s5901_s26 }
  0x31   : > { %592 = vrot.lane.b32.xlu1 %v4883_v27, %s4755_s29  ;;  %s4779_s29 = smov 48  }
  0x7f   : > { %v4890_v29 = vpop.permute.xlu1 %464 }
  0x83   : > { %v233_v30 = vpop.permute.xlu0 %232  ;;  %v4906_v36 = vpop.permute.xlu1 %466 }
  0x84   : > { %v4896_v32 = vsel %vm236_vm0, 0.0, %v233_v30  ;;  %v4931_v45 = vsel %vm468_vm2, %v4890_v29, %v4906_v36 }
  0x85   : > { %v473_v33 = vmul.f32 %v4890_v29, %v4896_v32  ;;  %v255_v42 = vmul.f32 %v4904_v35, %v4896_v32 }
  0x87   : > { %481 = vrot.lane.b32.xlu0 %v473_v33, %s4757_s7  ;;  %v235_v37 = vpop.permute.xlu0 %234  ;;  %v4935_v46 = vpop.permute.xlu1 %582 }
  0x88   : > { %v4910_v38 = vsel %vm236_vm0, %v233_v30, %v235_v37  ;;  %v4913_v39 = vsel %vm236_vm0, %v235_v37, 0.0 }
  0x89   : > { %v475_v40 = vmul.f32 %v4906_v36, %v4913_v39  ;;  %v256_v41 = vmul.f32 %v4901_v34, %v4910_v38  ;;  %v474_v47 = vmul.f32 %v4931_v45, %v4910_v38  ;;  %v591_v48 = vmul.f32 %v4935_v46, %v4913_v39 }
  0x8b   : > { %485 = vrot.lane.b32.xlu1 %v475_v40, %s4757_s7  ;;  %4092 = vmatprep.subr.msk.mxu0 %vm298_vm1, %v256_v41  ;;  %v4923_v43 = vpop.permute.xlu0 %580  ;;  %v4964_v53 = vpop.permute.xlu1 %790 }
  0x8c   : > { %4093 = vmatpush1.msk.msra.mxu0 %vm298_vm1, %v255_v42  ;;  %v589_v44 = vmul.f32 %v4923_v43, %v4896_v32  ;;  %v4952_v50 = vsel %vm584_vm4, %v4923_v43, %v4935_v46  ;;  %v799_v56 = vmul.f32 %v4964_v53, %v4913_v39 }
  0x8d   : > { %4094 = vmatmul.mubr.msk.f32.vlgmr.msra.gmra.mrb[0].mxu0 %vm295_vm3, %v4883_v27  ;;  %v590_v52 = vmul.f32 %v4952_v50, %v4910_v38 }
  0x8e   : > { %597 = vrot.lane.b32.xlu0 %v589_v44, %s4758_s9  ;;  %560 = vmatprep.mubr.f32.mxu0 %v4756_v28 }
  0x8f   : > { %693 = vrot.lane.b32.xlu1 %v4913_v39, %s4759_s10  ;;  %v4945_v49 = vpop.permute.xlu0 %788  ;;  %v4978_v57 = vpop.permute.xlu1 %906 }
  0x90   : > { %v797_v55 = vmul.f32 %v4945_v49, %v4896_v32  ;;  %v4987_v60 = vsel %vm792_vm5, %v4945_v49, %v4964_v53  ;;  %v915_v62 = vmul.f32 %v4978_v57, %v4913_v39 }
  0x91   : > { %v798_v61 = vmul.f32 %v4987_v60, %v4910_v38 }
  0x92   : > { %483 = vrot.lane.b32.xlu0 %v474_v47, %s4757_s7 }
  0x93   : > { %601 = vrot.lane.b32.xlu1 %v591_v48, %s4758_s9  ;;  %v4958_v51 = vpop.permute.xlu0 %904  ;;  %v4995_v63 = vpop.permute.xlu1 %1022 }
  0x94   : > { %v913_v59 = vmul.f32 %v4958_v51, %v4896_v32  ;;  %v5008_v5 = vsel %vm5898_vm6, %v4958_v51, %v4978_v57  ;;  %v1031_v8 = vmul.f32 %v4995_v63, %v4913_v39 }
  0x95   : > { %v914_v7 = vmul.f32 %v5008_v5, %v4910_v38 }
  0x96   : > { %691 = vrot.lane.b32.xlu0 %v4910_v38, %s4759_s10 }
  0x97   : > { %685 = vrot.lane.b32.xlu1 %v4883_v27, %s4758_s9  ;;  %v4966_v54 = vpop.permute.xlu0 %1020  ;;  %v5012_v6 = vpop.permute.xlu1 %270 }
  0x98   : > { %v1029_v1 = vmul.f32 %v4966_v54, %v4896_v32  ;;  %v279_v10 = vmul.f32 %v5012_v6, %v4913_v39  ;;  %v5027_v11 = vsel %vm5897_vm7, %v4966_v54, %v4995_v63  ;;  %vm5902_vm7 = vcmask 769024  }
  0x99   : > { %v1030_v13 = vmul.f32 %v5027_v11, %v4910_v38 }
  0x9a   : > { %599 = vrot.lane.b32.xlu0 %v590_v52, %s4758_s9 }
  0x9b   : > { %800 = vrot.lane.b32.xlu1 %v4883_v27, %s4760_s12  ;;  %v4980_v58 = vpop.permute.xlu0 %268  ;;  %v5029_v12 = vpop.permute.xlu1 %1138  ;;  %s4773_s12 = smov 72  }
  0x9c   : > { %v277_v9 = vmul.f32 %v4980_v58, %v4896_v32  ;;  %v1147_v14 = vmul.f32 %v5029_v12, %v4913_v39  ;;  %v5040_v15 = vsel %vm272_vm8, %v4980_v58, %v5012_v6 }
  0x9d   : > { %v278_v18 = vmul.f32 %v5040_v15, %v4910_v38 }
  0x9e   : > { %689 = vrot.lane.b32.xlu0 %v4896_v32, %s4759_s10 }
  0x9f   : > { %916 = vrot.lane.b32.xlu1 %v4883_v27, %s4761_s13  ;;  %v4997_v0 = vpop.permute.xlu0 %1136  ;;  %v477_v22 = vpop.permute.xlu1 %476 }
  0xa0   : > { %v1145_v2 = vmul.f32 %v4997_v0, %v4896_v32  ;;  %v5051_v19 = vsel %vm5896_vm9, %v4997_v0, %v5029_v12  ;;  %vm292_vm9 = vcmask 1039360  }
  0xa1   : > { %v1146_v20 = vmul.f32 %v5051_v19, %v4910_v38 }
  0xa2   : > { %805 = vrot.lane.b32.xlu0 %v797_v55, %s4762_s15 }
  0xa3   : > { %809 = vrot.lane.b32.xlu1 %v799_v56, %s4762_s15  ;;  %v593_v23 = vpop.permute.xlu1 %592 }
  0xa6   : > { %921 = vrot.lane.b32.xlu0 %v913_v59, %s4763_s16 }
  0xa7   : > { %1032 = vrot.lane.b32.xlu1 %v4883_v27, %s4764_s20  ;;  %s4774_s20 = smov 64  }
  0xaa   : > { %807 = vrot.lane.b32.xlu0 %v798_v61, %s4762_s15 }
  0xab   : > { %925 = vrot.lane.b32.xlu1 %v915_v62, %s4763_s16 }
  0xae   : > { %1037 = vrot.lane.b32.xlu0 %v1029_v1, %s4765_s21 }
  0xaf   : > { %1153 = vrot.lane.b32.xlu1 %v1145_v2, %s4766_s24 }
  0xb2   : > { %923 = vrot.lane.b32.xlu0 %v914_v7, %s4763_s16 }
  0xb3   : > { %1041 = vrot.lane.b32.xlu1 %v1031_v8, %s4765_s21 }
  0xb6   : > { %286 = vrot.lane.b32.xlu0 %v277_v9, %s4767_s25 }
  0xb7   : > { %290 = vrot.lane.b32.xlu1 %v279_v10, %s4767_s25 }
  0xba   : > { %1039 = vrot.lane.b32.xlu0 %v1030_v13, %s4765_s21 }
  0xbb   : > { %1157 = vrot.lane.b32.xlu1 %v1147_v14, %s4766_s24 }
  0xbe   : > { %288 = vrot.lane.b32.xlu0 %v278_v18, %s4767_s25 }
  0xbf   : > { %1148 = vrot.lane.b32.xlu1 %v4883_v27, %s4763_s16 }
  0xc2   : > { %1155 = vrot.lane.b32.xlu0 %v1146_v20, %s4766_s24 }
  0xc3   : > { %1255 = vperm.xlu1 %4563, %v229_v21  }
  0xc6   : > { %281 = vrot.lane.b32.xlu0 %v4883_v27, %s4770_s6  ;;  %s5899_s6 = smov 80  }
  0xc7   : > { %4564 = vset.pattern.permute.xlu1 %v4769_v17 }
  0xca   : > { %1243 = vperm.xlu0 %4562, %v229_v21  }
  0xf9   : > { %v482_v24 = vpop.permute.xlu0 %481 }
  0xfd   : > { %v486_v25 = vpop.permute.xlu1 %485 }
 0x100   : > { %v598_v26 = vpop.permute.xlu0 %597 }
 0x101   : > { %v694_v30 = vpop.permute.xlu1 %693 }
 0x104   : > { %v484_v31 = vpop.permute.xlu0 %483 }
 0x105   : > { %v488_v32 = vsel %vm487_vm10, %v482_v24, %v484_v31  ;;  %v602_v33 = vpop.permute.xlu1 %601  ;;  %v489_v37 = vsel %vm487_vm10, %v484_v31, %v486_v25 }
 0x106   : > { %4096 = vmatprep.subr.msk.mxu0 %vm298_vm1, %v489_v37 }
 0x107   : > { %4097 = vmatpush1.msk.msra.mxu0 %vm298_vm1, %v488_v32 }
 0x108   : > { %4098 = vmatmul.mubr.msk.f32.vlgmr.msra.gmra.mrb[0].mxu0 %vm295_vm3, %v477_v22  ;;  %v692_v27 = vpop.permute.xlu0 %691 }
 0x109   : > { %v686_v38 = vpop.permute.xlu1 %685  ;;  %676 = vmatprep.mubr.f32.mxu0 %v4756_v28  ;;  %v697_v44 = vsel %vm695_vm12, %v692_v27, %v694_v30 }
 0x10c   : > { %v600_v39 = vpop.permute.xlu0 %599 }
 0x10d   : > { %v604_v40 = vsel %vm603_vm11, %v598_v26, %v600_v39  ;;  %v801_v41 = vpop.permute.xlu1 %800  ;;  %v605_v42 = vsel %vm603_vm11, %v600_v39, %v602_v33 }
 0x10e   : > { %4100 = vmatprep.subr.msk.mxu0 %vm298_vm1, %v605_v42 }
 0x10f   : > { %4101 = vmatpush1.msk.msra.mxu0 %vm298_vm1, %v604_v40 }
 0x110   : > { %4102 = vmatmul.mubr.msk.f32.vlgmr.msra.gmra.mrb[0].mxu0 %vm295_vm3, %v593_v23  ;;  %4103 = vmatprep.subr.msk.mxu0 %vm298_vm1, %v697_v44  ;;  %v690_v47 = vpop.permute.xlu0 %689 }
 0x111   : > { %v696_v48 = vsel %vm695_vm12, %v690_v47, %v692_v27  ;;  %v917_v52 = vpop.permute.xlu1 %916  ;;  %768 = vmatprep.mubr.f32.mxu0 %v4756_v28 }
 0x112   : > { %4104 = vmatpush1.msk.msra.mxu0 %vm298_vm1, %v696_v48 }
 0x114   : > { %v806_v55 = vpop.permute.xlu0 %805 }
 0x115   : > { %v810_v56 = vpop.permute.xlu1 %809 }
 0x118   : > { %4105 = vmatmul.mubr.msk.f32.vlgmr.msra.gmra.mrb[0].mxu0 %vm295_vm3, %v686_v38  ;;  %v922_v59 = vpop.permute.xlu0 %921 }
 0x119   : > { %v1033_v61 = vpop.permute.xlu1 %1032  ;;  %884 = vmatprep.mubr.f32.mxu0 %v4756_v28 }
 0x11c   : > { %v808_v62 = vpop.permute.xlu0 %807 }
 0x11d   : > { %v812_v1 = vsel %vm811_vm13, %v806_v55, %v808_v62  ;;  %v926_v2 = vpop.permute.xlu1 %925  ;;  %v813_v7 = vsel %vm811_vm13, %v808_v62, %v810_v56 }
 0x11e   : > { %4107 = vmatprep.subr.msk.mxu0 %vm298_vm1, %v813_v7 }
 0x11f   : > { %4108 = vmatpush1.msk.msra.mxu0 %vm298_vm1, %v812_v1 }
 0x120   : > { %4109 = vmatmul.mubr.msk.f32.vlgmr.msra.gmra.mrb[0].mxu0 %vm295_vm3, %v801_v41  ;;  %v1038_v8 = vpop.permute.xlu0 %1037 }
 0x121   : > { %v1154_v9 = vpop.permute.xlu1 %1153  ;;  %1000 = vmatprep.mubr.f32.mxu0 %v4756_v28 }
 0x124   : > { %v924_v10 = vpop.permute.xlu0 %923 }
 0x125   : > { %v928_v13 = vsel %vm927_vm14, %v922_v59, %v924_v10  ;;  %v1042_v14 = vpop.permute.xlu1 %1041  ;;  %v929_v18 = vsel %vm927_vm14, %v924_v10, %v926_v2 }
 0x126   : > { %4111 = vmatprep.subr.msk.mxu0 %vm298_vm1, %v929_v18 }
 0x127   : > { %4112 = vmatpush1.msk.msra.mxu0 %vm298_vm1, %v928_v13 }
 0x128   : > { %4113 = vmatmul.mubr.msk.f32.vlgmr.msra.gmra.mrb[0].mxu0 %vm295_vm3, %v917_v52  ;;  %v287_v20 = vpop.permute.xlu0 %286 }
 0x129   : > { %1116 = vmatprep.mubr.f32.mxu0 %v4756_v28  ;;  %v291_v21 = vpop.permute.xlu1 %290 }
 0x12c   : > { %v1040_v22 = vpop.permute.xlu0 %1039 }
 0x12d   : > { %v1044_v23 = vsel %vm1043_vm15, %v1038_v8, %v1040_v22  ;;  %v1045_v24 = vsel %vm1043_vm15, %v1040_v22, %v1042_v14  ;;  %v1158_v26 = vpop.permute.xlu1 %1157  ;;  %v5116_v8 = vld [vmem:[%s5891_s1 + $0x20] sm:$0xff] }
 0x12e   : > { %4115 = vmatprep.subr.msk.mxu0 %vm298_vm1, %v1045_v24 }
 0x12f   : > { %4116 = vmatpush1.msk.msra.mxu0 %vm298_vm1, %v1044_v23 }
 0x130   : > { %4117 = vmatmul.mubr.msk.f32.vlgmr.msra.gmra.mrb[0].mxu0 %vm295_vm3, %v1033_v61  ;;  %v289_v25 = vpop.permute.xlu0 %288 }
 0x131   : > { %v294_v30 = vsel %vm292_vm9, %v289_v25, %v291_v21  ;;  %v293_v31 = vsel %vm292_vm9, %v287_v20, %v289_v25  ;;  %1232 = vmatprep.mubr.f32.mxu0 %v4756_v28  ;;  %v1149_v27 = vpop.permute.xlu1 %1148 }
 0x132   : > { %4089 = vmatprep.subr.msk.mxu1 %vm298_vm1, %v294_v30 }
 0x133   : > { %4090 = vmatpush1.msk.msra.mxu1 %vm298_vm1, %v293_v31 }
 0x134   : > { %v1156_v32 = vpop.permute.xlu0 %1155 }
 0x135   : > { %v1160_v33 = vsel %vm5902_vm7, %v1154_v9, %v1156_v32  ;;  %v1161_v37 = vsel %vm5902_vm7, %v1156_v32, %v1158_v26  ;;  %v5121_v9 = vld [vmem:[%s5891_s1 + $0x10] sm:$0xff] }
 0x136   : > { %4119 = vmatprep.subr.msk.mxu0 %vm298_vm1, %v1161_v37  ;;  %v4142_v26 = vld [vmem:[%s5892_s2 + $0x13] ss:$8 sm:$0x3]  ;;  %v5242_v32 = vld [vmem:[%s5892_s2 + $0x14] ss:$8 sm:$0x3] }
 0x137   : > { %4120 = vmatpush1.msk.msra.mxu0 %vm298_vm1, %v1160_v33  ;;  %v2338_v30 = vrot.slane %v4142_v26, %v4827_v4  ;;  %v2334_v31 = vrot.slane %v4142_v26, %v4825_v3  ;;  %v2393_v33 = vrot.slane %v5242_v32, %v4827_v4 }
 0x138   : > { %4121 = vmatmul.mubr.msk.f32.vlgmr.msra.gmra.mrb[0].mxu0 %vm295_vm3, %v1149_v27  ;;  %v282_v38 = vpop.permute.xlu0 %281 }
 0x139   : > { %4091 = vmatmul.mubr.msk.f32.vlgmr.msra.gmra.mrb[0].mxu1 %vm295_vm3, %v282_v38  ;;  %vm1300_vm3 = vcmask 64512  }
 0x13a   : > { %1369 = vmatprep.mubr.f32.mxu1 %v4756_v28 }
 0x142   : > { %v1256_v59 = vpop.permute.xlu1 %1255 }
 0x149   : > { %v1244_v40 = vpop.permute.xlu0 %1243 }
 0x20b   : > { %v1234_v39 = vpop.f32.mrb[0].mxu0 }
 0x20c   : > { %v369_v41 = vpop.f32.mrb[0].mxu1  ;;  %v1236_v42 = vpop.f32.mrb[1].mxu0 }
 0x20d   : > { %v4455_v44 = vadd.f32 %v1234_v39, %v369_v41  ;;  %v371_v47 = vpop.f32.mrb[1].mxu1 }
 0x20e   : > { %v4456_v48 = vadd.f32 %v1236_v42, %v371_v47 }
 0x20f   : > { %v1246_v52 = vadd.f32 %v4455_v44, %v1244_v40 }
 0x210   : > { %v1247_v55 = vadd.f32 %v4456_v48, %v1244_v40 }
 0x211   : > { %v1250_v56 = vmul.f32 0.1, %v1246_v52  ;;  %vm1248_vm6 = vcmp.ge.f32.partialorder %v1246_v52, 0.0 }
 0x212   : > { %v1251_v61 = vmul.f32 0.1, %v1247_v55  ;;  %vm1249_vm1 = vcmp.ge.f32.partialorder %v1247_v55, 0.0 }
 0x213   : > { %v1252_v62 = vsel %vm1248_vm6, %v1246_v52, %v1250_v56 }
 0x214   : > { %v1253_v1 = vsel %vm1249_vm1, %v1247_v55, %v1251_v61  ;;  %v1258_v2 = vadd.f32 %v1256_v59, %v1252_v62 }
 0x215   : > { %v1259_v7 = vadd.f32 %v1256_v59, %v1253_v1 }
 0x216   : > { %1266 = vrot.lane.b32.xlu1 %v1258_v2, %s4747_s28 }
 0x217   : > { %1268 = vrot.lane.b32.xlu0 %v1259_v7, %s4747_s28 }
 0x21a   : > { %1285 = vrot.lane.b32.xlu1 %v5116_v8, %s5901_s26 }
 0x21b   : > { %1283 = vrot.lane.b32.xlu0 %v5121_v9, %s5901_s26 }
 0x288   : > { %v1267_v10 = vpop.permute.xlu1 %1266 }
 0x289   : > { %v5128_v13 = vsel %vm236_vm0, 0.0, %v1267_v10  ;;  %v1269_v14 = vpop.permute.xlu0 %1268 }
 0x28a   : > { %v1275_v18 = vsel %vm236_vm0, %v1269_v14, 0.0  ;;  %v1278_v20 = vmul.f32 %v5128_v13, %v4980_v58  ;;  %v5134_v21 = vsel %vm236_vm0, %v1267_v10, %v1269_v14  ;;  %v1463_v24 = vmul.f32 %v5128_v13, %v4890_v29 }
 0x28b   : > { %v1280_v22 = vmul.f32 %v1275_v18, %v5012_v6  ;;  %v1279_v23 = vmul.f32 %v5134_v21, %v5040_v15  ;;  %v1568_v58 = vmul.f32 %v5128_v13, %v4923_v43  ;;  %v1464_v29 = vmul.f32 %v5134_v21, %v4931_v45 }
 0x28c   : > { %1290 = vrot.lane.b32.xlu1 %v1278_v20, %s4767_s25  ;;  %v1465_v6 = vmul.f32 %v1275_v18, %v4906_v36  ;;  %v1570_v43 = vmul.f32 %v1275_v18, %v4935_v46  ;;  %v1569_v45 = vmul.f32 %v5134_v21, %v4952_v50  ;;  %v1774_v36 = vmul.f32 %v5128_v13, %v4945_v49  ;;  %v1286_v37 = vpop.permute.xlu1 %1285 }
 0x28d   : > { %1294 = vrot.lane.b32.xlu0 %v1280_v22, %s4767_s25  ;;  %v1776_v46 = vmul.f32 %v1275_v18, %v4964_v53  ;;  %v1775_v50 = vmul.f32 %v5134_v21, %v4987_v60  ;;  %v1879_v15 = vmul.f32 %v5128_v13, %v4958_v51  ;;  %v1880_v49 = vmul.f32 %v5134_v21, %v5008_v5  ;;  %v1284_v27 = vpop.permute.xlu0 %1283 }
 0x28e   : > { %v1881_v53 = vmul.f32 %v1275_v18, %v4978_v57  ;;  %v1984_v51 = vmul.f32 %v5128_v13, %v4966_v54  ;;  %v1986_v60 = vmul.f32 %v1275_v18, %v4995_v63  ;;  %v1985_v5 = vmul.f32 %v5134_v21, %v5027_v11  ;;  %v1263_v11 = vld [vmem:[%s5891_s1 + $0x28] sm:$0xff] }
 0x28f   : > { %v2090_v57 = vmul.f32 %v5134_v21, %v5051_v19  ;;  %v2091_v54 = vmul.f32 %v1275_v18, %v5029_v12  ;;  %v2089_v63 = vmul.f32 %v5128_v13, %v4997_v0  ;;  %v1261_v12 = vld [vmem:[%s5891_s1 + $0x18] sm:$0xff]  ;;  %v1277_v47 = vmul.f32 %v5134_v21, %v4901_v34 }
 0x290   : > { %1292 = vrot.lane.b32.xlu1 %v1279_v23, %s4767_s25  ;;  %v4141_v0 = vld [vmem:[%s5892_s2 + $0x12] ss:$8 sm:$0x3]  ;;  %v1276_v48 = vmul.f32 %v5128_v13, %v4904_v35 }
 0x291   : > { %1473 = vrot.lane.b32.xlu0 %v1463_v24, %s4757_s7  ;;  %v2283_v19 = vrot.slane %v4141_v0, %v4827_v4  ;;  %v2279_v25 = vrot.slane %v4141_v0, %v4825_v3 }
 0x294   : > { %1466 = vrot.lane.b32.xlu1 %v5121_v9, %s4758_s9 }
 0x295   : > { %1468 = vrot.lane.b32.xlu0 %v5116_v8, %s4758_s9 }
 0x298   : > { %1578 = vrot.lane.b32.xlu1 %v1568_v58, %s4758_s9 }
 0x299   : > { %1571 = vrot.lane.b32.xlu0 %v5121_v9, %s4761_s13 }
 0x29c   : > { %1573 = vrot.lane.b32.xlu1 %v5116_v8, %s4761_s13  ;;  %s4771_s13 = smov 88  }
 0x29d   : > { %1475 = vrot.lane.b32.xlu0 %v1464_v29, %s4757_s7 }
 0x2a0   : > { %1477 = vrot.lane.b32.xlu1 %v1465_v6, %s4757_s7 }
 0x2a1   : > { %1681 = vrot.lane.b32.xlu0 %v5134_v21, %s4759_s10 }
 0x2a4   : > { %1683 = vrot.lane.b32.xlu1 %v1275_v18, %s4759_s10 }
 0x2a5   : > { %1582 = vrot.lane.b32.xlu0 %v1570_v43, %s4758_s9 }
 0x2a8   : > { %1580 = vrot.lane.b32.xlu1 %v1569_v45, %s4758_s9 }
 0x2a9   : > { %1679 = vrot.lane.b32.xlu0 %v5128_v13, %s4759_s10 }
 0x2ac   : > { %1673 = vrot.lane.b32.xlu1 %v5121_v9, %s4763_s16 }
 0x2ad   : > { %1675 = vrot.lane.b32.xlu0 %v5116_v8, %s4763_s16 }
 0x2b0   : > { %1784 = vrot.lane.b32.xlu1 %v1774_v36, %s4762_s15 }
 0x2b1   : > { %1777 = vrot.lane.b32.xlu0 %v5121_v9, %s4771_s13 }
 0x2b4   : > { %1779 = vrot.lane.b32.xlu1 %v5116_v8, %s4771_s13  ;;  %s4174_s13 = sshll.u32 %s5915_s19, 4 }
 0x2b5   : > { %1788 = vrot.lane.b32.xlu0 %v1776_v46, %s4762_s15 }
 0x2b8   : > { %1786 = vrot.lane.b32.xlu1 %v1775_v50, %s4762_s15 }
 0x2b9   : > { %1889 = vrot.lane.b32.xlu0 %v1879_v15, %s4763_s16 }
 0x2bc   : > { %1882 = vrot.lane.b32.xlu1 %v5121_v9, %s5899_s6 }
 0x2bd   : > { %1891 = vrot.lane.b32.xlu0 %v1880_v49, %s4763_s16 }
 0x2c0   : > { %1893 = vrot.lane.b32.xlu1 %v1881_v53, %s4763_s16 }
 0x2c1   : > { %1884 = vrot.lane.b32.xlu0 %v5116_v8, %s5899_s6 }
 0x2c4   : > { %1994 = vrot.lane.b32.xlu1 %v1984_v51, %s4765_s21 }
 0x2c5   : > { %1998 = vrot.lane.b32.xlu0 %v1986_v60, %s4765_s21 }
 0x2c8   : > { %1996 = vrot.lane.b32.xlu1 %v1985_v5, %s4765_s21 }
 0x2c9   : > { %1987 = vrot.lane.b32.xlu0 %v5121_v9, %s4773_s12 }
 0x2cc   : > { %1989 = vrot.lane.b32.xlu1 %v5116_v8, %s4773_s12  ;;  %s4776_s12 = smov 8  }
 0x2cd   : > { %2101 = vrot.lane.b32.xlu0 %v2090_v57, %s4766_s24 }
 0x2d0   : > { %2103 = vrot.lane.b32.xlu1 %v2091_v54, %s4766_s24 }
 0x2d1   : > { %2099 = vrot.lane.b32.xlu0 %v2089_v63, %s4766_s24 }
 0x2d4   : > { %2092 = vrot.lane.b32.xlu1 %v5121_v9, %s4774_s20 }
 0x2d5   : > { %2094 = vrot.lane.b32.xlu0 %v5116_v8, %s4774_s20 }
 0x2d8   : > { %2196 = vperm.xlu1 %4564, %v1261_v12  }
 0x2d9   : > { %2201 = vperm.xlu0 %4562, %v1263_v11  }
 0x2dc   : > { %4565 = vset.pattern.permute.xlu1 %v4768_v16 }
 0x2dd   : > { %4566 = vset.pattern.permute.xlu0 %v4768_v16  ;;  %2221 = vperm.xlu1 %4565, %v1261_v12  }
 0x2de   : > { %2225 = vperm.xlu0 %4566, %v1263_v11  }
 0x2e1   : > { %2286 = vrot.lane.b32.xlu1 %v2283_v19, %s4752_s22 }
 0x2e2   : > { %2284 = vrot.lane.b32.xlu0 %v2279_v25, %s4752_s22  ;;  %4727 = vset.pattern.permute.xlu1 %v4769_v17 }
 0x2e3   : > { %4728 = vset.pattern.permute.xlu0 %v4769_v17 }
 0x2e5   : > { %2341 = vrot.lane.b32.xlu1 %v2338_v30, %s4746_s27 }
 0x2e6   : > { %2339 = vrot.lane.b32.xlu0 %v2334_v31, %s4746_s27 }
 0x2e9   : > { %2396 = vrot.lane.b32.xlu1 %v2393_v33, %s4748_s8 }
 0x2fe   : > { %v1291_v38 = vpop.permute.xlu1 %1290 }
 0x2ff   : > { %v1295_v39 = vpop.permute.xlu0 %1294 }
 0x302   : > { %v1293_v40 = vpop.permute.xlu1 %1292 }
 0x303   : > { %v1474_v41 = vpop.permute.xlu0 %1473  ;;  %v1297_v42 = vsel %vm292_vm9, %v1293_v40, %v1295_v39  ;;  %v1296_v44 = vsel %vm292_vm9, %v1291_v38, %v1293_v40 }
 0x304   : > { %1305 = vmatprep.subr.mxu1 %v1297_v42 }
 0x305   : > { %1306 = vmatpush1.msra.mxu1 %v1296_v44 }
 0x306   : > { %4122 = vmatmul.mubr.msk.f32.vlgmr.msra.gmra.mrb[2].mxu1 %vm1300_vm3, %v1284_v27  ;;  %1386 = vmatprep.subr.mxu1 %v1277_v47  ;;  %v1467_v52 = vpop.permute.xlu1 %1466  ;;  %v4144_v27 = vld [vmem:[%s5892_s2 + $0x16] ss:$8 sm:$0x3] }
 0x307   : > { %v1469_v55 = vpop.permute.xlu0 %1468  ;;  %1387 = vmatpush1.msra.mxu1 %v1276_v48  ;;  %1375 = vmatprep.mubr.f32.mxu1 %v4756_v28  ;;  %v2476_v38 = vrot.slane %v4144_v27, %v4827_v4  ;;  %v2472_v39 = vrot.slane %v4144_v27, %v4825_v3 }
 0x309   : > { %2479 = vrot.lane.b32.xlu1 %v2476_v38, %s4749_s11 }
 0x30a   : > { %4123 = vmatmul.mubr.msk.f32.gmra.mrb[4].mxu1 %vm1300_vm3, %v1286_v37  ;;  %v1579_v56 = vpop.permute.xlu1 %1578  ;;  %v2389_v37 = vrot.slane %v5242_v32, %v4825_v3 }
 0x30b   : > { %v1572_v59 = vpop.permute.xlu0 %1571  ;;  %1450 = vmatprep.mubr.f32.mxu1 %v4756_v28 }
 0x30c   : > { %2394 = vrot.lane.b32.xlu0 %v2389_v37, %s4748_s8 }
 0x30e   : > { %4124 = vmatmul.mubr.msk.f32.vlgmr.msra.gmra.mrb[2].mxu1 %vm1300_vm3, %v5121_v9  ;;  %v1574_v34 = vpop.permute.xlu1 %1573 }
 0x30f   : > { %v1476_v61 = vpop.permute.xlu0 %1475  ;;  %1456 = vmatprep.mubr.f32.mxu1 %v4756_v28 }
 0x310   : > { %v1479_v2 = vsel %vm487_vm10, %v1474_v41, %v1476_v61  ;;  %2477 = vrot.lane.b32.xlu0 %v2472_v39, %s4749_s11 }
 0x312   : > { %4125 = vmatmul.mubr.msk.f32.gmra.mrb[4].mxu1 %vm1300_vm3, %v5116_v8  ;;  %v1478_v35 = vpop.permute.xlu1 %1477 }
 0x313   : > { %v1682_v62 = vpop.permute.xlu0 %1681  ;;  %v1480_v1 = vsel %vm487_vm10, %v1476_v61, %v1478_v35  ;;  %1551 = vmatprep.mubr.f32.mxu1 %v4756_v28 }
 0x314   : > { %1487 = vmatprep.subr.mxu1 %v1480_v1 }
 0x315   : > { %1488 = vmatpush1.msra.mxu1 %v1479_v2 }
 0x316   : > { %4126 = vmatmul.mubr.msk.f32.vlgmr.msra.gmra.mrb[2].mxu1 %vm1300_vm3, %v1467_v52  ;;  %v1684_v7 = vpop.permute.xlu1 %1683 }
 0x317   : > { %v1583_v9 = vpop.permute.xlu0 %1582  ;;  %1557 = vmatprep.mubr.f32.mxu1 %v4756_v28  ;;  %v1686_v18 = vsel %vm695_vm12, %v1682_v62, %v1684_v7 }
 0x31a   : > { %4127 = vmatmul.mubr.msk.f32.gmra.mrb[4].mxu1 %vm1300_vm3, %v1469_v55  ;;  %v1581_v10 = vpop.permute.xlu1 %1580 }
 0x31b   : > { %v1680_v8 = vpop.permute.xlu0 %1679  ;;  %v1585_v13 = vsel %vm603_vm11, %v1581_v10, %v1583_v9  ;;  %v1584_v14 = vsel %vm603_vm11, %v1579_v56, %v1581_v10  ;;  %1656 = vmatprep.mubr.f32.mxu1 %v4756_v28  ;;  %v4145_v10 = vld [vmem:[%s5892_s2 + $0x17] ss:$8 sm:$0x3] }
 0x31c   : > { %1592 = vmatprep.subr.mxu1 %v1585_v13  ;;  %v1685_v20 = vsel %vm695_vm12, %v1680_v8, %v1682_v62 }
 0x31d   : > { %1593 = vmatpush1.msra.mxu1 %v1584_v14 }
 0x31e   : > { %4128 = vmatmul.mubr.msk.f32.vlgmr.msra.gmra.mrb[2].mxu1 %vm1300_vm3, %v1572_v59  ;;  %1693 = vmatprep.subr.mxu1 %v1686_v18  ;;  %v1674_v21 = vpop.permute.xlu1 %1673  ;;  %v2527_v18 = vrot.slane %v4145_v10, %v4825_v3 }
 0x31f   : > { %v1676_v22 = vpop.permute.xlu0 %1675  ;;  %1694 = vmatpush1.msra.mxu1 %v1685_v20  ;;  %1662 = vmatprep.mubr.f32.mxu1 %v4756_v28  ;;  %v4146_v20 = vld [vmem:[%s5892_s2 + $0x20] ss:$8 sm:$0x3] }
 0x322   : > { %4129 = vmatmul.mubr.msk.f32.gmra.mrb[4].mxu1 %vm1300_vm3, %v1574_v34  ;;  %v1785_v23 = vpop.permute.xlu1 %1784 }
 0x323   : > { %v1778_v24 = vpop.permute.xlu0 %1777  ;;  %1757 = vmatprep.mubr.f32.mxu1 %v4756_v28 }
 0x326   : > { %4130 = vmatmul.mubr.msk.f32.vlgmr.msra.gmra.mrb[2].mxu1 %vm1300_vm3, %v1674_v21  ;;  %v1780_v58 = vpop.permute.xlu1 %1779 }
 0x327   : > { %v1789_v29 = vpop.permute.xlu0 %1788  ;;  %1763 = vmatprep.mubr.f32.mxu1 %v4756_v28 }
 0x32a   : > { %4131 = vmatmul.mubr.msk.f32.gmra.mrb[4].mxu1 %vm1300_vm3, %v1676_v22  ;;  %v1787_v6 = vpop.permute.xlu1 %1786  ;;  %v2582_v22 = vrot.slane %v4146_v20, %v4825_v3 }
 0x32b   : > { %v1890_v43 = vpop.permute.xlu0 %1889  ;;  %v1791_v45 = vsel %vm811_vm13, %v1787_v6, %v1789_v29  ;;  %v1790_v36 = vsel %vm811_vm13, %v1785_v23, %v1787_v6  ;;  %1862 = vmatprep.mubr.f32.mxu1 %v4756_v28  ;;  %v2531_v23 = vrot.slane %v4145_v10, %v4827_v4  ;;  %v2586_v29 = vrot.slane %v4146_v20, %v4827_v4 }
 0x32c   : > { %1798 = vmatprep.subr.mxu1 %v1791_v45 }
 0x32d   : > { %1799 = vmatpush1.msra.mxu1 %v1790_v36 }
 0x32e   : > { %4132 = vmatmul.mubr.msk.f32.vlgmr.msra.gmra.mrb[2].mxu1 %vm1300_vm3, %v1778_v24  ;;  %v1883_v46 = vpop.permute.xlu1 %1882  ;;  %v4147_v24 = vld [vmem:[%s5892_s2 + $0x21] ss:$8 sm:$0x3] }
 0x32f   : > { %v1892_v50 = vpop.permute.xlu0 %1891  ;;  %1868 = vmatprep.mubr.f32.mxu1 %v4756_v28  ;;  %v2641_v6 = vrot.slane %v4147_v24, %v4827_v4 }
 0x330   : > { %v1895_v51 = vsel %vm927_vm14, %v1890_v43, %v1892_v50 }
 0x332   : > { %4133 = vmatmul.mubr.msk.f32.gmra.mrb[4].mxu1 %vm1300_vm3, %v1780_v58  ;;  %v1894_v15 = vpop.permute.xlu1 %1893  ;;  %v2637_v58 = vrot.slane %v4147_v24, %v4825_v3  ;;  %v2688_v24 = vld [vmem:[%s5893_s3 + $0x10] sm:$0xff] }
 0x333   : > { %v1885_v49 = vpop.permute.xlu0 %1884  ;;  %v1896_v53 = vsel %vm927_vm14, %v1892_v50, %v1894_v15  ;;  %1967 = vmatprep.mubr.f32.mxu1 %v4756_v28 }
 0x334   : > { %1903 = vmatprep.subr.mxu1 %v1896_v53 }
 0x335   : > { %1904 = vmatpush1.msra.mxu1 %v1895_v51 }
 0x336   : > { %4134 = vmatmul.mubr.msk.f32.vlgmr.msra.gmra.mrb[2].mxu1 %vm1300_vm3, %v1883_v46  ;;  %v1995_v60 = vpop.permute.xlu1 %1994 }
 0x337   : > { %v1999_v5 = vpop.permute.xlu0 %1998  ;;  %1973 = vmatprep.mubr.f32.mxu1 %v4756_v28 }
 0x33a   : > { %4135 = vmatmul.mubr.msk.f32.gmra.mrb[4].mxu1 %vm1300_vm3, %v1885_v49  ;;  %v1997_v57 = vpop.permute.xlu1 %1996 }
 0x33b   : > { %v1988_v54 = vpop.permute.xlu0 %1987  ;;  %v2001_v63 = vsel %vm1043_vm15, %v1997_v57, %v1999_v5  ;;  %v2000_v11 = vsel %vm1043_vm15, %v1995_v60, %v1997_v57  ;;  %2072 = vmatprep.mubr.f32.mxu1 %v4756_v28 }
 0x33c   : > { %2008 = vmatprep.subr.mxu1 %v2001_v63 }
 0x33d   : > { %2009 = vmatpush1.msra.mxu1 %v2000_v11 }
 0x33e   : > { %4136 = vmatmul.mubr.msk.f32.vlgmr.msra.gmra.mrb[2].mxu1 %vm1300_vm3, %v1988_v54  ;;  %v1990_v12 = vpop.permute.xlu1 %1989 }
 0x33f   : > { %v2102_v0 = vpop.permute.xlu0 %2101  ;;  %2078 = vmatprep.mubr.f32.mxu1 %v4756_v28 }
 0x342   : > { %4137 = vmatmul.mubr.msk.f32.gmra.mrb[4].mxu1 %vm1300_vm3, %v1990_v12  ;;  %v2104_v19 = vpop.permute.xlu1 %2103 }
 0x343   : > { %v2100_v25 = vpop.permute.xlu0 %2099  ;;  %v2106_v26 = vsel %vm5902_vm7, %v2102_v0, %v2104_v19  ;;  %2177 = vmatprep.mubr.f32.mxu1 %v4756_v28 }
 0x344   : > { %v2105_v30 = vsel %vm5902_vm7, %v2100_v25, %v2102_v0  ;;  %2113 = vmatprep.subr.mxu1 %v2106_v26 }
 0x345   : > { %2114 = vmatpush1.msra.mxu1 %v2105_v30 }
 0x346   : > { %v2093_v31 = vpop.permute.xlu1 %2092 }
 0x347   : > { %4138 = vmatmul.mubr.msk.f32.vlgmr.msra.gmra.mrb[2].mxu1 %vm1300_vm3, %v2093_v31  ;;  %v2095_v33 = vpop.permute.xlu0 %2094 }
 0x348   : > { %2183 = vmatprep.mubr.f32.mxu1 %v4756_v28 }
 0x34b   : > { %4139 = vmatmul.mubr.msk.f32.gmra.mrb[4].mxu1 %vm1300_vm3, %v2095_v33 }
 0x357   : > { %v2197_v28 = vpop.permute.xlu1 %2196 }
 0x358   : > { %v2202_v32 = vpop.permute.xlu0 %2201 }
 0x35c   : > { %v2222_v48 = vpop.permute.xlu1 %2221 }
 0x35d   : > { %v2226_v2 = vpop.permute.xlu0 %2225 }
 0x360   : > { %v5343_v43 = vpop.permute.xlu1 %2286 }
 0x361   : > { %v5345_v45 = vpop.permute.xlu0 %2284 }
 0x362   : > { %v5362_v57 = vsel %vm272_vm8, %v5345_v45, %v5343_v43 }
 0x364   : > { %v5347_v36 = vpop.permute.xlu1 %2341 }
 0x365   : > { %v5349_v46 = vpop.permute.xlu0 %2339 }
 0x366   : > { %v5394_v39 = vsel %vm468_vm2, %v5349_v46, %v5347_v36  ;;  %vm5904_vm2 = vcmask 269312  }
 0x368   : > { %v5351_v50 = vpop.permute.xlu1 %2396 }
 0x37b   : > { %v5355_v49 = vpop.permute.xlu1 %2479 }
 0x37e   : > { %v5353_v15 = vpop.permute.xlu0 %2394 }
 0x37f   : > { %v5367_v54 = vsel %vm584_vm4, %v5353_v15, %v5351_v50 }
 0x382   : > { %v5357_v53 = vpop.permute.xlu0 %2477 }
 0x383   : > { %v5382_v26 = vsel %vm792_vm5, %v5357_v53, %v5355_v49  ;;  %vm5903_vm5 = vcmask 261120  }
 0x41a   : > { %v2179_v40 = vpop.f32.mrb[2].mxu1 }
 0x41b   : > { %v2204_v41 = vadd.f32 %v2197_v28, %v2179_v40  ;;  %v2181_v42 = vpop.f32.mrb[3].mxu1 }
 0x41c   : > { %v2205_v44 = vadd.f32 %v2197_v28, %v2181_v42 }
 0x41d   : > { %v2212_v47 = vmul.f32 0.1, %v2204_v41  ;;  %vm2208_vm6 = vcmp.ge.f32.partialorder %v2204_v41, 0.0 }
 0x41e   : > { %v2213_v52 = vmul.f32 0.1, %v2205_v44  ;;  %v2185_v55 = vpop.f32.mrb[4].mxu1  ;;  %vm2209_vm1 = vcmp.ge.f32.partialorder %v2205_v44, 0.0 }
 0x41f   : > { %v2206_v56 = vadd.f32 %v2202_v32, %v2185_v55  ;;  %v2187_v59 = vpop.f32.mrb[5].mxu1  ;;  %v2216_v34 = vsel %vm2208_vm6, %v2204_v41, %v2212_v47 }
 0x420   : > { %v2207_v61 = vadd.f32 %v2202_v32, %v2187_v59  ;;  %v2228_v35 = vadd.f32 %v2222_v48, %v2216_v34  ;;  %v2217_v1 = vsel %vm2209_vm1, %v2205_v44, %v2213_v52  ;;  %v2702_v34 = vld [vmem:[%s5893_s3 + $0x80] sm:$0xff] }
 0x421   : > { %v2214_v62 = vmul.f32 0.1, %v2206_v56  ;;  %vm2210_vm3 = vcmp.ge.f32.partialorder %v2206_v56, 0.0  ;;  %v2229_v8 = vadd.f32 %v2222_v48, %v2217_v1 }
 0x422   : > { %v2215_v7 = vmul.f32 0.1, %v2207_v61  ;;  %2236 = vrot.lane.b32.xlu1 %v2228_v35, %s4747_s28  ;;  %vm2211_vm7 = vcmp.ge.f32.partialorder %v2207_v61, 0.0 }
 0x423   : > { %v2218_v9 = vsel %vm2210_vm3, %v2206_v56, %v2214_v62 }
 0x424   : > { %v2230_v13 = vadd.f32 %v2226_v2, %v2218_v9  ;;  %v2219_v14 = vsel %vm2211_vm7, %v2207_v61, %v2215_v7  ;;  %v2703_v61 = vld [vmem:[%s5893_s3 + $0x88] sm:$0xff]  ;;  %vm5905_vm7 = vcmask 277504  }
 0x425   : > { %v2231_v21 = vadd.f32 %v2226_v2, %v2219_v14  ;;  %v2686_v2 = vld [vmem:[%s5893_s3] sm:$0xff]  ;;  %v2687_v7 = vld [vmem:[%s5893_s3 + $0x8] sm:$0xff]  ;;  %v2704_v14 = vld [vmem:[%s5893_s3 + $0x90] sm:$0xff] }
 0x426   : > { %2240 = vrot.lane.b32.xlu0 %v2230_v13, %s4747_s28  ;;  %2238 = vrot.lane.b32.xlu1 %v2229_v8, %s4747_s28  ;;  %v4363_v13 = vpack.c.bf16 %v2703_v61, %v2702_v34  ;;  %v2692_v61 = vld [vmem:[%s5893_s3 + $0x30] sm:$0xff] }
 0x428   : > { %4364 = vmatprep.subr.bf16.mxu0 %v4363_v13 }
 0x42a   : > { %2532 = vrot.lane.b32.xlu0 %v2527_v18, %s4750_s14  ;;  %2242 = vrot.lane.b32.xlu1 %v2231_v21, %s4747_s28  ;;  %v2705_v18 = vld [vmem:[%s5893_s3 + $0x98] sm:$0xff] }
 0x42e   : > { %2587 = vrot.lane.b32.xlu0 %v2582_v22, %s4751_s17  ;;  %2534 = vrot.lane.b32.xlu1 %v2531_v23, %s4750_s14 }
 0x432   : > { %2642 = vrot.lane.b32.xlu0 %v2637_v58, %s4753_s23  ;;  %2589 = vrot.lane.b32.xlu1 %v2586_v29, %s4751_s17  ;;  %v2689_v58 = vld [vmem:[%s5893_s3 + $0x18] sm:$0xff] }
 0x436   : > { %2644 = vrot.lane.b32.xlu1 %v2641_v6, %s4753_s23  ;;  %v4365_v6 = vpack.c.bf16 %v2687_v7, %v2686_v2  ;;  %s5910_s23 = smov 120  }
 0x438   : > { %4366 = vmatpush3.bf16.msra.mxu0 %v4365_v6 }
 0x494   : > { %v2237_v51 = vpop.permute.xlu1 %2236 }
 0x498   : > { %v2241_v60 = vpop.permute.xlu0 %2240  ;;  %v2239_v5 = vpop.permute.xlu1 %2238 }
 0x499   : > { %v5370_v63 = vsel %vm236_vm0, %v2237_v51, %v2239_v5  ;;  %v2254_v11 = vsel %vm236_vm0, %v2239_v5, 0.0  ;;  %v5470_v5 = vsel %vm236_vm0, 0.0, %v2237_v51  ;;  %v2707_v51 = vld [vmem:[%s5893_s3 + $0xa8] sm:$0xff] }
 0x49a   : > { %v4567_v12 = vpack.i.bf16 %v2254_v11, %v5370_v63  ;;  %v2403_v0 = vadd.f32 %v5367_v54, %v5370_v63  ;;  %v2404_v19 = vadd.f32 %v5351_v50, %v2254_v11  ;;  %v2293_v25 = vadd.f32 %v5362_v57, %v5370_v63 }
 0x49b   : > { %v2294_v30 = vadd.f32 %v5343_v43, %v2254_v11  ;;  %v2486_v27 = vadd.f32 %v5382_v26, %v5370_v63  ;;  %v2487_v38 = vadd.f32 %v5355_v49, %v2254_v11  ;;  %v2348_v40 = vadd.f32 %v5394_v39, %v5370_v63 }
 0x49c   : > { %v5385_v31 = vpop.permute.xlu0 %2532  ;;  %4568 = vrot.lane.b32.xlu0 %v4567_v12, %s4759_s10  ;;  %v2243_v33 = vpop.permute.xlu1 %2242  ;;  %v4582_v37 = vpack.i.bf16 %v2404_v19, %v2403_v0  ;;  %v2349_v41 = vadd.f32 %v5347_v36, %v2254_v11  ;;  %v4367_v12 = vpack.c.bf16 %v2705_v18, %v2704_v14  ;;  %v2694_v18 = vld [vmem:[%s5893_s3 + $0x40] sm:$0xff]  ;;  %v2485_v6 = vadd.f32 %v5357_v53, %v5470_v5 }
 0x49d   : > { %v4572_v28 = vpack.i.bf16 %v2294_v30, %v2293_v25  ;;  %v4587_v44 = vpack.i.bf16 %v2487_v38, %v2486_v27  ;;  %v5449_v20 = vsel %vm236_vm0, %v2241_v60, %v2243_v33  ;;  %v5452_v21 = vsel %vm236_vm0, %v2243_v33, 0.0  ;;  %v2706_v33 = vld [vmem:[%s5893_s3 + $0xa0] sm:$0xff] }
 0x49e   : > { %4583 = vrot.lane.b32.xlu1 %v4582_v37, %s4758_s9  ;;  %v4577_v55 = vpack.i.bf16 %v2349_v41, %v2348_v40  ;;  %v4607_v19 = vpack.i.bf16 %v5449_v20, %v5470_v5  ;;  %v2297_v25 = vadd.f32 %v5343_v43, %v5452_v21  ;;  %v4369_v30 = vpack.c.bf16 %v2689_v58, %v2688_v24  ;;  %v2690_v37 = vld [vmem:[%s5893_s3 + $0x20] sm:$0xff]  ;;  %v2691_v43 = vld [vmem:[%s5893_s3 + $0x28] sm:$0xff] }
 0x49f   : > { %4368 = vmatprep.subr.bf16.mxu0 %v4367_v12  ;;  %v2296_v40 = vadd.f32 %v5362_v57, %v5449_v20  ;;  %v2406_v41 = vadd.f32 %v5367_v54, %v5449_v20  ;;  %v2708_v57 = vld [vmem:[%s5893_s3 + $0xb0] sm:$0xff]  ;;  %v2709_v54 = vld [vmem:[%s5893_s3 + $0xb8] sm:$0xff]  ;;  %v2352_v13 = vadd.f32 %v5347_v36, %v5452_v21  ;;  %v2489_v58 = vadd.f32 %v5382_v26, %v5449_v20 }
 0x4a0   : > { %4573 = vrot.lane.b32.xlu0 %v4572_v28, %s4767_s25  ;;  %v5401_v42 = vpop.permute.xlu1 %2534  ;;  %v5408_v47 = vpop.permute.xlu0 %2587  ;;  %4370 = vmatpush3.bf16.msra.mxu0 %v4369_v30  ;;  %v4375_v34 = vpack.c.bf16 %v2709_v54, %v2708_v57  ;;  %v2712_v12 = vld [vmem:[%s5893_s3 + $0xd0] sm:$0xff]  ;;  %v2713_v26 = vld [vmem:[%s5893_s3 + $0xd8] sm:$0xff] }
 0x4a1   : > { %v5406_v32 = vsel %vm5903_vm5, %v5385_v31, %v5401_v42  ;;  %v2542_v48 = vadd.f32 %v5401_v42, %v2254_v11  ;;  %v2716_v57 = vld [vmem:[%s5893_s3 + $0xf0] sm:$0xff]  ;;  %v2717_v54 = vld [vmem:[%s5893_s3 + $0xf8] sm:$0xff]  ;;  %vm3940_vm5 = vcmask 523264  }
 0x4a2   : > { %v2541_v52 = vadd.f32 %v5406_v32, %v5370_v63  ;;  %4588 = vrot.lane.b32.xlu1 %v4587_v44, %s4762_s15  ;;  %v4373_v44 = vpack.c.bf16 %v2691_v43, %v2690_v37  ;;  %v2715_v37 = vld [vmem:[%s5893_s3 + $0xe8] sm:$0xff] }
 0x4a4   : > { %4578 = vrot.lane.b32.xlu0 %v4577_v55, %s4757_s7  ;;  %v5415_v56 = vpop.permute.xlu1 %2589  ;;  %v4592_v35 = vpack.i.bf16 %v2542_v48, %v2541_v52  ;;  %v5437_v9 = vpop.permute.xlu0 %2642  ;;  %v2292_v48 = vadd.f32 %v5345_v45, %v5470_v5  ;;  %v2402_v52 = vadd.f32 %v5353_v15, %v5470_v5  ;;  %v2351_v55 = vadd.f32 %v5394_v39, %v5449_v20 }
 0x4a5   : > { %v5420_v59 = vsel %vm5904_vm2, %v5408_v47, %v5415_v56  ;;  %v2597_v62 = vadd.f32 %v5415_v56, %v2254_v11  ;;  %v2347_v39 = vadd.f32 %v5349_v46, %v5470_v5 }
 0x4a6   : > { %v2596_v1 = vadd.f32 %v5420_v59, %v5370_v63 }
 0x4a8   : > { %v4597_v10 = vpack.i.bf16 %v2597_v62, %v2596_v1  ;;  %4593 = vrot.lane.b32.xlu0 %v4592_v35, %s4763_s16  ;;  %v5440_v8 = vpop.permute.xlu1 %2644  ;;  %v4617_v35 = vpack.i.bf16 %v2296_v40, %v2292_v48  ;;  %v4632_v62 = vpack.i.bf16 %v2406_v41, %v2402_v52  ;;  %v2407_v1 = vadd.f32 %v5351_v50, %v5452_v21  ;;  %v2711_v50 = vld [vmem:[%s5893_s3 + $0xc8] sm:$0xff] }
 0x4a9   : > { %v5457_v22 = vsel %vm5905_vm7, %v5437_v9, %v5440_v8  ;;  %v2652_v23 = vadd.f32 %v5440_v8, %v2254_v11  ;;  %v5473_v11 = vsel %vm236_vm0, 0.0, %v2241_v60  ;;  %v4371_v60 = vpack.c.bf16 %v2707_v51, %v2706_v33 }
 0x4aa   : > { %v2651_v29 = vadd.f32 %v5457_v22, %v5370_v63  ;;  %4598 = vrot.lane.b32.xlu1 %v4597_v10, %s4765_s21  ;;  %v2295_v27 = vadd.f32 %v5345_v45, %v5473_v11  ;;  %v4612_v38 = vpack.i.bf16 %v5473_v11, %v5452_v21  ;;  %v2693_v45 = vld [vmem:[%s5893_s3 + $0x38] sm:$0xff]  ;;  %v2405_v7 = vadd.f32 %v5353_v15, %v5473_v11  ;;  %v2710_v10 = vld [vmem:[%s5893_s3 + $0xc0] sm:$0xff]  ;;  %v2695_v15 = vld [vmem:[%s5893_s3 + $0x48] sm:$0xff] }
 0x4ab   : > { %4372 = vmatprep.subr.bf16.mxu0 %v4371_v60  ;;  %v4377_v2 = vpack.c.bf16 %v2693_v45, %v2692_v61  ;;  %v4379_v14 = vpack.c.bf16 %v2711_v50, %v2710_v10  ;;  %v2350_v36 = vadd.f32 %v5349_v46, %v5473_v11  ;;  %v2697_v46 = vld [vmem:[%s5893_s3 + $0x58] sm:$0xff]  ;;  %v4647_v33 = vpack.i.bf16 %v2489_v58, %v2485_v6 }
 0x4ac   : > { %v4602_v0 = vpack.i.bf16 %v2652_v23, %v2651_v29  ;;  %v4627_v28 = vpack.i.bf16 %v2295_v27, %v2297_v25  ;;  %4374 = vmatpush3.bf16.msra.mxu0 %v4373_v44  ;;  %v4622_v23 = vpack.i.bf16 %v2351_v55, %v2347_v39  ;;  %v4642_v24 = vpack.i.bf16 %v2405_v7, %v2407_v1  ;;  %v2696_v25 = vld [vmem:[%s5893_s3 + $0x50] sm:$0xff]  ;;  %v2698_v27 = vld [vmem:[%s5893_s3 + $0x60] sm:$0xff]  ;;  %v2701_v55 = vld [vmem:[%s5893_s3 + $0x78] sm:$0xff] }
 0x4ad   : > { %4376 = vmatprep.subr.bf16.mxu0 %v4375_v34  ;;  %v4381_v29 = vpack.c.bf16 %v2695_v15, %v2694_v18  ;;  %v4637_v30 = vpack.i.bf16 %v2350_v36, %v2352_v13  ;;  %v2490_v51 = vadd.f32 %v5355_v49, %v5452_v21  ;;  %v4385_v60 = vpack.c.bf16 %v2697_v46, %v2696_v25  ;;  %v2699_v49 = vld [vmem:[%s5893_s3 + $0x68] sm:$0xff]  ;;  %v4140_v50 = vld [vmem:[%s5892_s2 + $0x11] ss:$8 sm:$0x3] }
 0x4ae   : > { %4608 = vrot.lane.b32.xlu1 %v4607_v19, %s4759_s10  ;;  %4603 = vrot.lane.b32.xlu0 %v4602_v0, %s4766_s24  ;;  %v2544_v0 = vadd.f32 %v5406_v32, %v5449_v20  ;;  %v4383_v19 = vpack.c.bf16 %v2713_v26, %v2712_v12  ;;  %v2714_v32 = vld [vmem:[%s5893_s3 + $0xe0] sm:$0xff]  ;;  %v2545_v40 = vadd.f32 %v5401_v42, %v5452_v21  ;;  %vm5906_vm0 = vcmask 769024  }
 0x4af   : > { %v4387_v43 = vpack.c.bf16 %v2715_v37, %v2714_v32  ;;  %v2599_v44 = vadd.f32 %v5420_v59, %v5449_v20  ;;  %v4389_v52 = vpack.c.bf16 %v2699_v49, %v2698_v27  ;;  %v4391_v42 = vpack.c.bf16 %v2717_v54, %v2716_v57  ;;  %v2700_v59 = vld [vmem:[%s5893_s3 + $0x70] sm:$0xff] }
 0x4b0   : > { %4378 = vmatpush3.bf16.msra.mxu0 %v4377_v2  ;;  %v2595_v34 = vadd.f32 %v5408_v47, %v5470_v5  ;;  %v2598_v1 = vadd.f32 %v5408_v47, %v5473_v11  ;;  %v2650_v2 = vadd.f32 %v5437_v9, %v5470_v5 }
 0x4b1   : > { %4380 = vmatprep.subr.bf16.mxu0 %v4379_v14 }
 0x4b2   : > { %4613 = vrot.lane.b32.xlu1 %v4612_v38, %s4759_s10  ;;  %4628 = vrot.lane.b32.xlu0 %v4627_v28, %s4767_s25  ;;  %v2540_v38 = vadd.f32 %v5385_v31, %v5470_v5  ;;  %v2488_v28 = vadd.f32 %v5357_v53, %v5473_v11  ;;  %v2543_v53 = vadd.f32 %v5385_v31, %v5473_v11 }
 0x4b3   : > { %v2600_v31 = vadd.f32 %v5415_v56, %v5452_v21  ;;  %v4662_v45 = vpack.i.bf16 %v2599_v44, %v2595_v34  ;;  %v2655_v56 = vadd.f32 %v5440_v8, %v5452_v21  ;;  %v2266_v8 = vrot.slane %v4140_v50, %v4827_v4 }
 0x4b4   : > { %4382 = vmatpush3.bf16.msra.mxu0 %v4381_v29  ;;  %v4652_v41 = vpack.i.bf16 %v2544_v0, %v2540_v38  ;;  %v4657_v48 = vpack.i.bf16 %v2488_v28, %v2490_v51  ;;  %v4667_v61 = vpack.i.bf16 %v2543_v53, %v2545_v40 }
 0x4b5   : > { %4384 = vmatprep.subr.bf16.mxu0 %v4383_v19  ;;  %v4677_v39 = vpack.i.bf16 %v2598_v1, %v2600_v31  ;;  %v2270_v15 = vadd.f32 %v2266_v8, %v5370_v63  ;;  %v2262_v31 = vrot.slane %v4140_v50, %v4825_v3  ;;  %v2272_v3 = vadd.f32 %v2266_v8, %v5449_v20 }
 0x4b6   : > { %4618 = vrot.lane.b32.xlu1 %v4617_v35, %s4767_s25  ;;  %4633 = vrot.lane.b32.xlu0 %v4632_v62, %s4758_s9  ;;  %v2654_v35 = vadd.f32 %v5457_v22, %v5449_v20  ;;  %v4393_v62 = vpack.c.bf16 %v2701_v55, %v2700_v59  ;;  %v2653_v22 = vadd.f32 %v5437_v9, %v5473_v11 }
 0x4b8   : > { %4386 = vmatpush3.bf16.msra.mxu0 %v4385_v60  ;;  %v4672_v7 = vpack.i.bf16 %v2654_v35, %v2650_v2  ;;  %v4682_v47 = vpack.i.bf16 %v2653_v22, %v2655_v56  ;;  %v2269_v56 = vadd.f32 %v2262_v31, %v5470_v5 }
 0x4b9   : > { %4388 = vmatprep.subr.bf16.mxu0 %v4387_v43 }
 0x4ba   : > { %4623 = vrot.lane.b32.xlu1 %v4622_v23, %s4757_s7  ;;  %4643 = vrot.lane.b32.xlu0 %v4642_v24, %s4758_s9 }
 0x4bc   : > { %4390 = vmatpush3.bf16.msra.mxu0 %v4389_v52 }
 0x4bd   : > { %4392 = vmatprep.subr.bf16.mxu0 %v4391_v42 }
 0x4be   : > { %4638 = vrot.lane.b32.xlu1 %v4637_v30, %s4757_s7  ;;  %4648 = vrot.lane.b32.xlu0 %v4647_v33, %s4762_s15 }
 0x4c0   : > { %4394 = vmatpush3.bf16.msra.mxu0 %v4393_v62 }
 0x4c2   : > { %4653 = vrot.lane.b32.xlu1 %v4652_v41, %s4763_s16  ;;  %4658 = vrot.lane.b32.xlu0 %v4657_v48, %s4762_s15 }
 0x4c6   : > { %4668 = vrot.lane.b32.xlu1 %v4667_v61, %s4763_s16  ;;  %4663 = vrot.lane.b32.xlu0 %v4662_v45, %s4765_s21 }
 0x4ca   : > { %4673 = vrot.lane.b32.xlu1 %v4672_v7, %s4766_s24  ;;  %4678 = vrot.lane.b32.xlu0 %v4677_v39, %s4765_s21  ;;  %s4775_s21 = smov 9  }
 0x4ce   : > { %4683 = vrot.lane.b32.xlu1 %v4682_v47, %s4766_s24  ;;  %s5911_s24 = smov 80  }
 0x50e   : > { %v5624_v10 = vpop.permute.xlu0 %4568 }
 0x50f   : > { %v4571_v26 = vunpack.i.h.bf16 %v5624_v10  ;;  %v4570_v4 = vunpack.i.l.bf16 %v5624_v10 }
 0x510   : > { %v5629_v13 = vpop.permute.xlu1 %4583 }
 0x511   : > { %v4586_v24 = vunpack.i.h.bf16 %v5629_v13  ;;  %v4585_v58 = vunpack.i.l.bf16 %v5629_v13  ;;  %v2455_v60 = vsel %vm695_vm12, %v4570_v4, %v4571_v26 }
 0x512   : > { %v4574_v21 = vpop.permute.xlu0 %4573 }
 0x513   : > { %v4576_v14 = vunpack.i.h.bf16 %v4574_v21  ;;  %v4575_v9 = vunpack.i.l.bf16 %v4574_v21  ;;  %v2427_v63 = vsel %vm603_vm11, %v4585_v58, %v4586_v24  ;;  %v2271_v21 = vadd.f32 %v2262_v31, %v5473_v11 }
 0x514   : > { %v5636_v12 = vpop.permute.xlu1 %4588 }
 0x515   : > { %v2317_v18 = vsel %vm292_vm9, %v4575_v9, %v4576_v14  ;;  %v4591_v46 = vunpack.i.h.bf16 %v5636_v12  ;;  %v4590_v30 = vunpack.i.l.bf16 %v5636_v12 }
 0x516   : > { %v4579_v23 = vpop.permute.xlu0 %4578  ;;  %v2325_v6 = vmax.f32 %v2270_v15, %v2317_v18 }
 0x517   : > { %v4581_v29 = vunpack.i.h.bf16 %v4579_v23  ;;  %v4580_v36 = vunpack.i.l.bf16 %v4579_v23  ;;  %v2510_v27 = vsel %vm811_vm13, %v4590_v30, %v4591_v46 }
 0x519   : > { %v2372_v0 = vsel %vm487_vm10, %v4580_v36, %v4581_v29 }
 0x51a   : > { %v2380_v19 = vmax.f32 %v2325_v6, %v2372_v0  ;;  %v5641_v25 = vpop.permute.xlu0 %4593 }
 0x51b   : > { %v4596_v32 = vunpack.i.h.bf16 %v5641_v25  ;;  %v4595_v37 = vunpack.i.l.bf16 %v5641_v25 }
 0x51c   : > { %v2435_v33 = vmax.f32 %v2380_v19, %v2427_v63  ;;  %v5646_v51 = vpop.permute.xlu1 %4598 }
 0x51d   : > { %v4601_v49 = vunpack.i.h.bf16 %v5646_v51  ;;  %v4600_v38 = vunpack.i.l.bf16 %v5646_v51  ;;  %v2565_v44 = vsel %vm927_vm14, %v4595_v37, %v4596_v32 }
 0x51e   : > { %v2463_v43 = vmax.f32 %v2435_v33, %v2455_v60 }
 0x51f   : > { %v2620_v54 = vsel %vm1043_vm15, %v4600_v38, %v4601_v49 }
 0x520   : > { %v2518_v28 = vmax.f32 %v2463_v43, %v2510_v27  ;;  %v5656_v40 = vpop.permute.xlu0 %4603  ;;  %v5658_v41 = vpop.permute.xlu1 %4608 }
 0x521   : > { %v4606_v48 = vunpack.i.h.bf16 %v5656_v40  ;;  %v4605_v52 = vunpack.i.l.bf16 %v5656_v40  ;;  %v4610_v62 = vunpack.i.l.bf16 %v5658_v41 }
 0x522   : > { %v2573_v57 = vmax.f32 %v2518_v28, %v2565_v44 }
 0x523   : > { %v2675_v55 = vsel %vm5906_vm0, %v4605_v52, %v4606_v48  ;;  %v2454_v14 = vsel %vm695_vm12, %v4610_v62, %v4570_v4 }
 0x524   : > { %v4629_v53 = vpop.permute.xlu0 %4628  ;;  %v4614_v42 = vpop.permute.xlu1 %4613  ;;  %v2628_v59 = vmax.f32 %v2573_v57, %v2620_v54 }
 0x525   : > { %v4631_v47 = vunpack.i.h.bf16 %v4629_v53  ;;  %v4630_v10 = vunpack.i.l.bf16 %v4629_v53  ;;  %v4616_v23 = vunpack.i.h.bf16 %v4614_v42  ;;  %v4615_v33 = vunpack.i.l.bf16 %v4614_v42 }
 0x526   : > { %v2683_v34 = vmax.f32 %v2628_v59, %v2675_v55 }
 0x528   : > { %v4634_v61 = vpop.permute.xlu0 %4633  ;;  %v4619_v45 = vpop.permute.xlu1 %4618  ;;  %2782 = vmatprep.mubr.f32.mxu0 %v2683_v34 }
 0x529   : > { %v4620_v35 = vunpack.i.l.bf16 %v4619_v45  ;;  %v4621_v1 = vunpack.i.h.bf16 %v4619_v45  ;;  %v4635_v39 = vunpack.i.l.bf16 %v4634_v61  ;;  %v4636_v60 = vunpack.i.h.bf16 %v4634_v61 }
 0x52b   : > { %v2316_v2 = vsel %vm292_vm9, %v4620_v35, %v4575_v9  ;;  %v2318_v18 = vsel %vm292_vm9, %v4631_v47, %v4621_v1  ;;  %v2319_v15 = vsel %vm292_vm9, %v4621_v1, %v4630_v10  ;;  %v2426_v5 = vsel %vm603_vm11, %v4635_v39, %v4585_v58  ;;  %vm5907_vm9 = vmmov %vm5906_vm0 }
 0x52c   : > { %v4644_v7 = vpop.permute.xlu0 %4643  ;;  %v4624_v22 = vpop.permute.xlu1 %4623  ;;  %v2324_v50 = vmax.f32 %v2269_v56, %v2316_v2  ;;  %v2326_v8 = vmax.f32 %v2271_v21, %v2318_v18  ;;  %v2327_v63 = vmax.f32 %v2272_v3, %v2319_v15  ;;  %v4611_v58 = vunpack.i.h.bf16 %v5658_v41 }
 0x52d   : > { %v4625_v13 = vunpack.i.l.bf16 %v4624_v22  ;;  %v4646_v24 = vunpack.i.h.bf16 %v4644_v7  ;;  %v4645_v0 = vunpack.i.l.bf16 %v4644_v7  ;;  %v4626_v11 = vunpack.i.h.bf16 %v4624_v22 }
 0x52e   : > { %v2456_v53 = vsel %vm695_vm12, %v4616_v23, %v4611_v58  ;;  %v2457_v41 = vsel %vm695_vm12, %v4611_v58, %v4615_v33  ;;  %v2814_v58 = vld [vmem:[%s5892_s2 + $0x23] ss:$0 sm:$0xff]  ;;  %vm2805_vm12 = vcmask 72704  }
 0x52f   : > { %v2371_v9 = vsel %vm487_vm10, %v4625_v13, %v4580_v36  ;;  %v2428_v48 = vsel %vm603_vm11, %v4646_v24, %v4636_v60  ;;  %v2429_v57 = vsel %vm603_vm11, %v4636_v60, %v4645_v0  ;;  %vm5909_vm11 = vmmov %vm5906_vm0 }
 0x530   : > { %v2379_v29 = vmax.f32 %v2324_v50, %v2371_v9  ;;  %v4649_v6 = vpop.permute.xlu0 %4648  ;;  %v4639_v26 = vpop.permute.xlu1 %4638 }
 0x531   : > { %v4641_v19 = vunpack.i.h.bf16 %v4639_v26  ;;  %v4640_v20 = vunpack.i.l.bf16 %v4639_v26  ;;  %v4650_v46 = vunpack.i.l.bf16 %v4649_v6  ;;  %v4651_v39 = vunpack.i.h.bf16 %v4649_v6 }
 0x532   : > { %v2434_v4 = vmax.f32 %v2379_v29, %v2426_v5 }
 0x533   : > { %v2373_v32 = vsel %vm487_vm10, %v4641_v19, %v4626_v11  ;;  %v2374_v36 = vsel %vm487_vm10, %v4626_v11, %v4640_v20  ;;  %v2509_v42 = vsel %vm811_vm13, %v4650_v46, %v4590_v30  ;;  %vm5908_vm10 = vmmov %vm5906_vm0 }
 0x534   : > { %v2462_v43 = vmax.f32 %v2434_v4, %v2454_v14  ;;  %v2381_v27 = vmax.f32 %v2326_v8, %v2373_v32  ;;  %v2382_v49 = vmax.f32 %v2327_v63, %v2374_v36  ;;  %v4659_v28 = vpop.permute.xlu0 %4658  ;;  %v4654_v44 = vpop.permute.xlu1 %4653 }
 0x535   : > { %v4655_v54 = vunpack.i.l.bf16 %v4654_v44  ;;  %v4661_v61 = vunpack.i.h.bf16 %v4659_v28  ;;  %v4660_v31 = vunpack.i.l.bf16 %v4659_v28  ;;  %v4656_v30 = vunpack.i.h.bf16 %v4654_v44  ;;  %v2993_v28 = vld [vmem:[%s5892_s2 + $0x24] ss:$0 sm:$0xff]  ;;  %v3386_v44 = vld [vmem:[%s5892_s2 + $0x30] ss:$0 sm:$0xff] }
 0x536   : > { %v2436_v59 = vmax.f32 %v2381_v27, %v2428_v48  ;;  %v2437_v55 = vmax.f32 %v2382_v49, %v2429_v57  ;;  %v2517_v34 = vmax.f32 %v2462_v43, %v2509_v42  ;;  %v3093_v49 = vld [vmem:[%s5892_s2 + $0x25] ss:$0 sm:$0xff]  ;;  %v3286_v48 = vld [vmem:[%s5892_s2 + $0x27] ss:$0 sm:$0xff]  ;;  %v3486_v57 = vld [vmem:[%s5892_s2 + $0x31] ss:$0 sm:$0xff] }
 0x537   : > { %v2564_v62 = vsel %vm927_vm14, %v4655_v54, %v4595_v37  ;;  %v2511_v22 = vsel %vm811_vm13, %v4661_v61, %v4651_v39  ;;  %v2512_v47 = vsel %vm811_vm13, %v4651_v39, %v4660_v31  ;;  %v3586_v54 = vld [vmem:[%s5892_s2 + $0x32] ss:$0 sm:$0xff]  ;;  %vm2808_vm13 = vcmask 596992   ;;  %v2811_v31 = vld [vmem:[%s5892_s2 + $0x22] ss:$0 sm:$0xff] }
 0x538   : > { %v2464_v45 = vmax.f32 %v2436_v59, %v2456_v53  ;;  %v2465_v35 = vmax.f32 %v2437_v55, %v2457_v41  ;;  %v4664_v1 = vpop.permute.xlu0 %4663  ;;  %v4669_v2 = vpop.permute.xlu1 %4668  ;;  %v2572_v10 = vmax.f32 %v2517_v34, %v2564_v62  ;;  %v5738_v53 = vld [vmem:[%s5891_s1 + $0x40] sm:$0xff]  ;;  %v5745_v42 = vld [vmem:[%s5891_s1 + $0x30] sm:$0xff] }
 0x539   : > { %v4665_v56 = vunpack.i.l.bf16 %v4664_v1  ;;  %v4671_v12 = vunpack.i.h.bf16 %v4669_v2  ;;  %v4670_v7 = vunpack.i.l.bf16 %v4669_v2  ;;  %v4666_v3 = vunpack.i.h.bf16 %v4664_v1 }
 0x53a   : > { %v2519_v21 = vmax.f32 %v2464_v45, %v2511_v22  ;;  %v2520_v25 = vmax.f32 %v2465_v35, %v2512_v47 }
 0x53b   : > { %v2619_v13 = vsel %vm1043_vm15, %v4665_v56, %v4600_v38  ;;  %v2566_v37 = vsel %vm927_vm14, %v4671_v12, %v4656_v30  ;;  %v2567_v18 = vsel %vm927_vm14, %v4656_v30, %v4670_v7 }
 0x53c   : > { %v4679_v50 = vpop.permute.xlu0 %4678  ;;  %v4674_v14 = vpop.permute.xlu1 %4673  ;;  %v2627_v5 = vmax.f32 %v2572_v10, %v2619_v13  ;;  %v2574_v38 = vmax.f32 %v2519_v21, %v2566_v37  ;;  %v2575_v6 = vmax.f32 %v2520_v25, %v2567_v18 }
 0x53d   : > { %v4681_v15 = vunpack.i.h.bf16 %v4679_v50  ;;  %v4680_v9 = vunpack.i.l.bf16 %v4679_v50  ;;  %v4675_v23 = vunpack.i.l.bf16 %v4674_v14  ;;  %v4676_v11 = vunpack.i.h.bf16 %v4674_v14 }
 0x53f   : > { %v2621_v24 = vsel %vm1043_vm15, %v4681_v15, %v4666_v3  ;;  %v2622_v29 = vsel %vm1043_vm15, %v4666_v3, %v4680_v9  ;;  %v2674_v51 = vsel %vm5907_vm9, %v4675_v23, %v4605_v52 }
 0x540   : > { %v2682_v26 = vmax.f32 %v2627_v5, %v2674_v51  ;;  %v4684_v0 = vpop.permute.xlu1 %4683  ;;  %v2630_v8 = vmax.f32 %v2575_v6, %v2622_v29  ;;  %v2629_v63 = vmax.f32 %v2574_v38, %v2621_v24 }
 0x541   : > { %v4686_v19 = vunpack.i.h.bf16 %v4684_v0  ;;  %v4685_v20 = vunpack.i.l.bf16 %v4684_v0 }
 0x542   : > { %2783 = vmatmul.mubr.f32.vlgmr.msra.gmra.mrb[2].mxu0 %v2682_v26 }
 0x543   : > { %v2677_v4 = vsel %vm5908_vm10, %v4676_v11, %v4685_v20  ;;  %v2676_v46 = vsel %vm5909_vm11, %v4686_v19, %v4676_v11  ;;  %v5785_v19 = vld [vmem:[%s5891_s1 + $0x38] sm:$0xff]  ;;  %v5790_v20 = vld [vmem:[%s5891_s1 + $0x48] sm:$0xff] }
 0x544   : > { %v2685_v33 = vmax.f32 %v2630_v8, %v2677_v4  ;;  %v2684_v60 = vmax.f32 %v2629_v63, %v2676_v46  ;;  %v3711_v8 = vld [vmem:[%s5891_s1 + $0x58] sm:$0xff] }
 0x546   : > { %2787 = vmatprep.mubr.f32.mxu0 %v2685_v33 }
 0x547   : > { %2788 = vmatmul.mubr.f32.gmra.mrb[4].mxu0 %v2684_v60 }
 0x615   : > { %v4207_v40 = vpop.f32.mrb[2].mxu0 }
 0x616   : > { %v4208_v52 = vpop.f32.mrb[3].mxu0 }
 0x617   : > { %v4209_v32 = vadd.f32 %v4208_v52, %v4207_v40 }
 0x619   : > { %2799 = vrot.lane.b32.xlu0 %v4209_v32, %s4775_s21 }
 0x61a   : > { %v4210_v36 = vpop.f32.mrb[4].mxu0 }
 0x61b   : > { %v4211_v43 = vpop.f32.mrb[5].mxu0 }
 0x61c   : > { %v4212_v27 = vadd.f32 %v4211_v43, %v4210_v36 }
 0x61d   : > { %2816 = vrot.lane.b32.xlu0 %v2814_v58, %s4752_s22  ;;  %s4777_s22 = smov 10  }
 0x61e   : > { %2801 = vrot.lane.b32.xlu1 %v4212_v27, %s4775_s21 }
 0x621   : > { %3095 = vrot.lane.b32.xlu0 %v3093_v49, %s4776_s12 }
 0x622   : > { %2995 = vrot.lane.b32.xlu1 %v2993_v28, %s4746_s27 }
 0x625   : > { %3388 = vrot.lane.b32.xlu0 %v3386_v44, %s4748_s8 }
 0x626   : > { %3288 = vrot.lane.b32.xlu1 %v3286_v48, %s4777_s22 }
 0x62a   : > { %3488 = vrot.lane.b32.xlu1 %v3486_v57, %s4747_s28  ;;  %s226_s28 = scalar_lea.vmem %s5895_s5, %s4174_s13 }
 0x62e   : > { %3588 = vrot.lane.b32.xlu1 %v3586_v54, %s4749_s11 }
 0x632   : > { %2825 = vrot.lane.b32.xlu1 %v5738_v53, %s4758_s9 }
 0x636   : > { %3000 = vrot.lane.b32.xlu1 %v5745_v42, %s4763_s16 }
 0x68b   : > { %v2800_v59 = vpop.permute.xlu0 %2799 }
 0x68c   : > { %v2806_v55 = vsel %vm2805_vm12, 0.0, %v2800_v59 }
 0x68d   : > { %v2809_v34 = vsel %vm2808_vm13, %v2806_v55, 0.0 }
 0x68e   : > { %v2812_v39 = vmul.f32 %v2811_v31, %v2809_v34 }
 0x68f   : > { %v2817_v41 = vpop.permute.xlu0 %2816 }
 0x690   : > { %v2802_v61 = vpop.permute.xlu1 %2801  ;;  %v2819_v62 = vmul.f32 %v2817_v41, %v2809_v34 }
 0x691   : > { %v2807_v45 = vsel %vm2805_vm12, 0.0, %v2802_v61 }
 0x692   : > { %v2810_v35 = vsel %vm2808_vm13, %v2807_v45, 0.0 }
 0x693   : > { %v3096_v1 = vpop.permute.xlu0 %3095  ;;  %v2820_v2 = vmul.f32 %v2817_v41, %v2810_v35  ;;  %v2813_v56 = vmul.f32 %v2811_v31, %v2810_v35  ;;  %v4702_v15 = vpack.i.bf16 %v2810_v35, %v2809_v34 }
 0x694   : > { %v3098_v12 = vmul.f32 %v3096_v1, %v2809_v34  ;;  %v3099_v7 = vmul.f32 %v3096_v1, %v2810_v35  ;;  %v2996_v30 = vpop.permute.xlu1 %2995 }
 0x695   : > { %v4687_v22 = vpack.i.bf16 %v2820_v2, %v2819_v62  ;;  %v5752_v47 = vpack.c.bf16 %v2813_v56, %v2812_v39  ;;  %v2998_v13 = vmul.f32 %v2996_v30, %v2809_v34  ;;  %v2999_v21 = vmul.f32 %v2996_v30, %v2810_v35 }
 0x696   : > { %v4697_v10 = vpack.i.bf16 %v3099_v7, %v3098_v12 }
 0x697   : > { %4688 = vrot.lane.b32.xlu0 %v4687_v22, %s4767_s25  ;;  %v4692_v3 = vpack.i.bf16 %v2999_v21, %v2998_v13  ;;  %s4778_s25 = smov 118   ;;  %v3389_v5 = vpop.permute.xlu0 %3388 }
 0x698   : > { %4698 = vrot.lane.b32.xlu1 %v4697_v10, %s5910_s23  ;;  %v3289_v25 = vpop.permute.xlu1 %3288  ;;  %v3391_v29 = vmul.f32 %v3389_v5, %v2809_v34  ;;  %v3392_v51 = vmul.f32 %v3389_v5, %v2810_v35 }
 0x699   : > { %v3291_v37 = vmul.f32 %v3289_v25, %v2809_v34  ;;  %v3292_v50 = vmul.f32 %v3289_v25, %v2810_v35 }
 0x69a   : > { %v4712_v38 = vpack.i.bf16 %v3392_v51, %v3391_v29 }
 0x69b   : > { %2823 = vrot.lane.b32.xlu0 %v5745_v42, %s4758_s9  ;;  %v4707_v14 = vpack.i.bf16 %v3292_v50, %v3291_v37 }
 0x69c   : > { %3102 = vrot.lane.b32.xlu1 %v5738_v53, %s5911_s24  ;;  %v3489_v18 = vpop.permute.xlu1 %3488 }
 0x69d   : > { %v3491_v9 = vmul.f32 %v3489_v18, %v2809_v34  ;;  %v3492_v23 = vmul.f32 %v3489_v18, %v2810_v35  ;;  %v3710_v18 = vld [vmem:[%s5891_s1 + $0x50] sm:$0xff] }
 0x69e   : > { %4334 = vmatprep.mubr.msk.f32.mxu1 %vm584_vm4, %v3710_v18 }
 0x69f   : > { %4693 = vrot.lane.b32.xlu0 %v4692_v3, %s4757_s7  ;;  %s4780_s7 = smov 119   ;;  %v4717_v24 = vpack.i.bf16 %v3492_v23, %v3491_v9 }
 0x6a0   : > { %3193 = vrot.lane.b32.xlu1 %v5745_v42, %s4774_s20  ;;  %v3589_v6 = vpop.permute.xlu1 %3588 }
 0x6a1   : > { %v3591_v26 = vmul.f32 %v3589_v6, %v2809_v34  ;;  %v3592_v0 = vmul.f32 %v3589_v6, %v2810_v35 }
 0x6a3   : > { %3002 = vrot.lane.b32.xlu0 %v5738_v53, %s4763_s16  ;;  %v4722_v11 = vpack.i.bf16 %v3592_v0, %v3591_v26 }
 0x6a4   : > { %4708 = vrot.lane.b32.xlu1 %v4707_v14, %s4778_s25  ;;  %v2826_v63 = vpop.permute.xlu1 %2825 }
 0x6a7   : > { %3100 = vrot.lane.b32.xlu0 %v5745_v42, %s5911_s24 }
 0x6a8   : > { %3295 = vrot.lane.b32.xlu1 %v5738_v53, %s4779_s29  ;;  %v3001_v4 = vpop.permute.xlu1 %3000 }
 0x6ab   : > { %4703 = vrot.lane.b32.xlu0 %v4702_v15, %s4780_s7  ;;  %v3713_v15 = vld [vmem:[%s5891_s1 + $0x68] sm:$0xff] }
 0x6ac   : > { %3393 = vrot.lane.b32.xlu1 %v5745_v42, %s4750_s14 }
 0x6af   : > { %3195 = vrot.lane.b32.xlu0 %v5738_v53, %s4774_s20 }
 0x6b0   : > { %4718 = vrot.lane.b32.xlu1 %v4717_v24, %s4759_s10 }
 0x6b3   : > { %3293 = vrot.lane.b32.xlu0 %v5745_v42, %s4779_s29 }
 0x6b4   : > { %3495 = vrot.lane.b32.xlu1 %v5738_v53, %s4748_s8 }
 0x6b7   : > { %4713 = vrot.lane.b32.xlu0 %v4712_v38, %s4758_s9 }
 0x6b8   : > { %3685 = vperm.xlu1 %4727, %v5785_v19  }
 0x6bb   : > { %3395 = vrot.lane.b32.xlu0 %v5738_v53, %s4750_s14 }
 0x6bc   : > { %4729 = vset.pattern.permute.xlu1 %v4768_v16 }
 0x6bd   : > { %3701 = vperm.xlu1 %4729, %v5785_v19  }
 0x6bf   : > { %3493 = vrot.lane.b32.xlu0 %v5745_v42, %s4748_s8 }
 0x6c1   : > { %3705 = vperm.xlu1 %4729, %v5790_v20  }
 0x6c3   : > { %4723 = vrot.lane.b32.xlu0 %v4722_v11, %s4762_s15 }
 0x6c5   : > { %4730 = vset.pattern.permute.xlu1 %v4769_v17 }
 0x6c6   : > { %3721 = vperm.xlu1 %4730, %v3713_v15  }
 0x6c7   : > { %3689 = vperm.xlu0 %4728, %v5790_v20  }
 0x6ca   : > { %4732 = vset.pattern.permute.xlu1 %v4768_v16 }
 0x6cb   : > { %3716 = vperm.xlu0 %4728, %v3711_v8   ;;  %3816 = vperm.xlu1 %4732, %v3713_v15  }
 0x6cf   : > { %4731 = vset.pattern.permute.xlu0 %v4768_v16  ;;  %4733 = vset.pattern.permute.xlu1 %v4769_v17 }
 0x6d0   : > { %3812 = vperm.xlu0 %4731, %v3711_v8  }
 0x6d4   : > { %4734 = vset.pattern.permute.xlu0 %v4769_v17  ;;  %v3712_v17 = vld [vmem:[%s5891_s1 + $0x60] sm:$0xff] }
 0x709   : > { %v4689_v46 = vpop.permute.xlu0 %4688 }
 0x70a   : > { %v4691_v33 = vunpack.i.h.bf16 %v4689_v46  ;;  %v4690_v60 = vunpack.i.l.bf16 %v4689_v46  ;;  %v4699_v32 = vpop.permute.xlu1 %4698  ;;  %v3822_v46 = vld [vmem:[%s5891_s1 + $0x78] sm:$0xff] }
 0x70b   : > { %v4701_v44 = vunpack.i.h.bf16 %v4699_v32  ;;  %v4700_v48 = vunpack.i.l.bf16 %v4699_v32  ;;  %3827 = vperm.xlu1 %4733, %v3822_v46  }
 0x70c   : > { %v4395_v40 = vpack.c.bf16 %v4691_v33, %v4690_v60  ;;  %v3824_v33 = vld [vmem:[%s5891_s1 + $0x88] sm:$0xff] }
 0x70d   : > { %v2824_v52 = vpop.permute.xlu0 %2823  ;;  %v4407_v54 = vpack.c.bf16 %v4701_v44, %v4700_v48  ;;  %3832 = vperm.xlu0 %4734, %v3824_v33  }
 0x70e   : > { %4396 = vmatprep.subr.bf16.mxu0 %v4395_v40  ;;  %4271 = vmatprep.mubr.msk.f32.mxu0 %vm584_vm4, %v2824_v52  ;;  %v3103_v49 = vpop.permute.xlu1 %3102 }
 0x70f   : > { %4398 = vmatpush3.bf16.msra.mxu0 %v4395_v40  ;;  %4735 = vset.pattern.permute.xlu1 %v4768_v16 }
 0x710   : > { %4400 = vmatprep.subr.bf16.mxu0 %v5752_v47  ;;  %3923 = vperm.xlu1 %4735, %v3822_v46  }
 0x711   : > { %v4694_v36 = vpop.permute.xlu0 %4693  ;;  %4736 = vset.pattern.permute.xlu0 %v4768_v16  ;;  %v3932_v16 = vld [vmem:[%s5894_s4] sm:$0xff] }
 0x712   : > { %v4696_v58 = vunpack.i.h.bf16 %v4694_v36  ;;  %v4695_v43 = vunpack.i.l.bf16 %v4694_v36  ;;  %4272 = vmatmul.mubr.msk.f32.vlgmr.msra.gmra.mrb[6].mxu0 %vm584_vm4, %v2826_v63  ;;  %v3194_v59 = vpop.permute.xlu1 %3193 }
 0x713   : > { %4402 = vmatpush3.bf16.msra.mxu0 %v5752_v47  ;;  %4278 = vmatprep.mubr.msk.f32.mxu0 %vm584_vm4, %v5745_v42 }
 0x714   : > { %v4403_v27 = vpack.c.bf16 %v4696_v58, %v4695_v43  ;;  %3927 = vperm.xlu1 %4735, %v3824_v33  }
 0x715   : > { %v3003_v28 = vpop.permute.xlu0 %3002 }
 0x716   : > { %4404 = vmatprep.subr.bf16.mxu0 %v4403_v27  ;;  %v4709_v61 = vpop.permute.xlu1 %4708 }
 0x717   : > { %v4711_v35 = vunpack.i.h.bf16 %v4709_v61 }
 0x719   : > { %v3101_v57 = vpop.permute.xlu0 %3100 }
 0x71a   : > { %4279 = vmatmul.mubr.msk.f32.vlgmr.msra.gmra.mrb[6].mxu0 %vm584_vm4, %v5738_v53  ;;  %v4710_v53 = vunpack.i.l.bf16 %v4709_v61  ;;  %v3296_v62 = vpop.permute.xlu1 %3295  ;;  %v3823_v61 = vld [vmem:[%s5891_s1 + $0x80] sm:$0xff] }
 0x71b   : > { %4406 = vmatpush3.bf16.msra.mxu0 %v4403_v27  ;;  %4285 = vmatprep.mubr.msk.f32.mxu0 %vm584_vm4, %v3001_v4  ;;  %v3821_v4 = vld [vmem:[%s5891_s1 + $0x70] sm:$0xff] }
 0x71c   : > { %4408 = vmatprep.subr.bf16.mxu0 %v4407_v54  ;;  %v4415_v2 = vpack.c.bf16 %v4711_v35, %v4710_v53  ;;  %v3937_v35 = vld [vmem:[%s5894_s4 + $0x28] sm:$0xff] }
 0x71d   : > { %v4704_v55 = vpop.permute.xlu0 %4703 }
 0x71e   : > { %v4706_v41 = vunpack.i.h.bf16 %v4704_v55  ;;  %v4705_v34 = vunpack.i.l.bf16 %v4704_v55  ;;  %v3394_v39 = vpop.permute.xlu1 %3393 }
 0x720   : > { %v4411_v42 = vpack.c.bf16 %v4706_v41, %v4705_v34  ;;  %v3934_v34 = vld [vmem:[%s5894_s4 + $0x10] sm:$0xff] }
 0x721   : > { %v3196_v31 = vpop.permute.xlu0 %3195 }
 0x722   : > { %4286 = vmatmul.mubr.msk.f32.vlgmr.msra.gmra.mrb[6].mxu0 %vm584_vm4, %v3003_v28  ;;  %v4719_v22 = vpop.permute.xlu1 %4718 }
 0x723   : > { %4410 = vmatpush3.bf16.msra.mxu0 %v4407_v54  ;;  %4292 = vmatprep.mubr.msk.f32.mxu0 %vm584_vm4, %v3101_v57  ;;  %v4721_v10 = vunpack.i.h.bf16 %v4719_v22  ;;  %v4720_v13 = vunpack.i.l.bf16 %v4719_v22  ;;  %v3933_v54 = vld [vmem:[%s5894_s4 + $0x8] sm:$0xff] }
 0x724   : > { %4412 = vmatprep.subr.bf16.mxu0 %v4411_v42  ;;  %v4439_v41 = vpack.c.bf16 %v3933_v54, %v3932_v16 }
 0x725   : > { %v3294_v45 = vpop.permute.xlu0 %3293  ;;  %v4423_v21 = vpack.c.bf16 %v4721_v10, %v4720_v13 }
 0x726   : > { %v3496_v14 = vpop.permute.xlu1 %3495 }
 0x729   : > { %v4714_v1 = vpop.permute.xlu0 %4713 }
 0x72a   : > { %4293 = vmatmul.mubr.msk.f32.vlgmr.msra.gmra.mrb[6].mxu0 %vm584_vm4, %v3103_v49  ;;  %v4716_v56 = vunpack.i.h.bf16 %v4714_v1  ;;  %v4715_v12 = vunpack.i.l.bf16 %v4714_v1  ;;  %v3939_v1 = vld [vmem:[%s5894_s4 + $0x38] sm:$0xff] }
 0x72b   : > { %4414 = vmatpush3.bf16.msra.mxu0 %v4411_v42  ;;  %4299 = vmatprep.mubr.msk.f32.mxu0 %vm584_vm4, %v3194_v59  ;;  %v3935_v42 = vld [vmem:[%s5894_s4 + $0x18] sm:$0xff] }
 0x72c   : > { %4416 = vmatprep.subr.bf16.mxu0 %v4415_v2  ;;  %v4419_v30 = vpack.c.bf16 %v4716_v56, %v4715_v12 }
 0x72d   : > { %v3396_v7 = vpop.permute.xlu0 %3395 }
 0x731   : > { %v3494_v47 = vpop.permute.xlu0 %3493 }
 0x732   : > { %4300 = vmatmul.mubr.msk.f32.vlgmr.msra.gmra.mrb[6].mxu0 %vm584_vm4, %v3196_v31  ;;  %v4443_v31 = vpack.c.bf16 %v3935_v42, %v3934_v34 }
 0x733   : > { %4418 = vmatpush3.bf16.msra.mxu0 %v4415_v2  ;;  %4306 = vmatprep.mubr.msk.f32.mxu0 %vm584_vm4, %v3294_v45  ;;  %v3936_v45 = vld [vmem:[%s5894_s4 + $0x20] sm:$0xff] }
 0x734   : > { %4420 = vmatprep.subr.bf16.mxu0 %v4419_v30  ;;  %v4447_v53 = vpack.c.bf16 %v3937_v35, %v3936_v45 }
 0x735   : > { %v4724_v25 = vpop.permute.xlu0 %4723 }
 0x736   : > { %v4726_v3 = vunpack.i.h.bf16 %v4724_v25  ;;  %v4725_v37 = vunpack.i.l.bf16 %v4724_v25 }
 0x737   : > { %v3686_v9 = vpop.permute.xlu1 %3685 }
 0x738   : > { %v4427_v50 = vpack.c.bf16 %v4726_v3, %v4725_v37 }
 0x73a   : > { %4307 = vmatmul.mubr.msk.f32.vlgmr.msra.gmra.mrb[6].mxu0 %vm584_vm4, %v3296_v62  ;;  %v3938_v62 = vld [vmem:[%s5894_s4 + $0x30] sm:$0xff] }
 0x73b   : > { %4422 = vmatpush3.bf16.msra.mxu0 %v4419_v30  ;;  %4313 = vmatprep.mubr.msk.f32.mxu0 %vm584_vm4, %v3394_v39  ;;  %v4451_v2 = vpack.c.bf16 %v3939_v1, %v3938_v62 }
 0x73c   : > { %4424 = vmatprep.subr.bf16.mxu0 %v4423_v21  ;;  %v3702_v23 = vpop.permute.xlu1 %3701 }
 0x740   : > { %v3706_v0 = vpop.permute.xlu1 %3705 }
 0x742   : > { %4314 = vmatmul.mubr.msk.f32.vlgmr.msra.gmra.mrb[6].mxu0 %vm584_vm4, %v3396_v7 }
 0x743   : > { %4426 = vmatpush3.bf16.msra.mxu0 %v4423_v21  ;;  %4320 = vmatprep.mubr.msk.f32.mxu0 %vm584_vm4, %v3494_v47 }
 0x744   : > { %4428 = vmatprep.subr.bf16.mxu0 %v4427_v50 }
 0x745   : > { %v3722_v60 = vpop.permute.xlu1 %3721 }
 0x746   : > { %v3690_v5 = vpop.permute.xlu0 %3689 }
 0x74a   : > { %4321 = vmatmul.mubr.msk.f32.vlgmr.msra.gmra.mrb[6].mxu0 %vm584_vm4, %v3496_v14  ;;  %v3717_v40 = vpop.permute.xlu0 %3716  ;;  %v3817_v27 = vpop.permute.xlu1 %3816 }
 0x74b   : > { %4430 = vmatpush3.bf16.msra.mxu0 %v4427_v50  ;;  %4327 = vmatprep.mubr.msk.f32.mxu0 %vm584_vm4, %v5785_v19 }
 0x74f   : > { %v3813_v28 = vpop.permute.xlu0 %3812 }
 0x752   : > { %4328 = vmatmul.mubr.msk.f32.vlgmr.msra.gmra.mrb[6].mxu0 %vm584_vm4, %v5790_v20 }
 0x78a   : > { %v3828_v39 = vpop.permute.xlu1 %3827 }
 0x78c   : > { %v3833_v56 = vpop.permute.xlu0 %3832 }
 0x78f   : > { %v3924_v22 = vpop.permute.xlu1 %3923 }
 0x793   : > { %v3928_v37 = vpop.permute.xlu1 %3927 }
 0x825   : > { %v4329_v24 = vpop.f32.mrb[6].mxu0 }
 0x826   : > { %v3693_v29 = vadd.f32 %v4329_v24, %v3690_v5  ;;  %v3673_v51 = vpop.f32.mrb[7].mxu0 }
 0x827   : > { %v3692_v38 = vadd.f32 %v3686_v9, %v3673_v51 }
 0x828   : > { %v3697_v6 = vmul.f32 0.1, %v3693_v29  ;;  %vm3695_vm14 = vcmp.ge.f32.partialorder %v3693_v29, 0.0 }
 0x829   : > { %vm3694_vm15 = vcmp.ge.f32.partialorder %v3692_v38, 0.0  ;;  %v3696_v26 = vmul.f32 0.1, %v3692_v38 }
 0x82a   : > { %v3699_v11 = vsel %vm3695_vm14, %v3693_v29, %v3697_v6 }
 0x82b   : > { %v3698_v19 = vsel %vm3694_vm15, %v3692_v38, %v3696_v26  ;;  %v3709_v20 = vadd.f32 %v3706_v0, %v3699_v11 }
 0x82c   : > { %v3708_v8 = vadd.f32 %v3702_v23, %v3698_v19 }
 0x82e   : > { %v4431_v63 = vpack.c.bf16 %v3709_v20, %v3708_v8 }
 0x830   : > { %4432 = vmatprep.subr.bf16.mxu1 %v4431_v63 }
 0x831   : > { %4434 = vmatpush3.bf16.msra.mxu1 %v4431_v63 }
 0x834   : > { %4335 = vmatmul.mubr.msk.f32.vlgmr.msra.gmra.mrb[6].mxu1 %vm584_vm4, %v3712_v17 }
 0x835   : > { %4341 = vmatprep.mubr.msk.f32.mxu1 %vm584_vm4, %v3821_v4 }
 0x907   : > { %v4336_v52 = vpop.f32.mrb[6].mxu1 }
 0x908   : > { %v3802_v32 = vadd.f32 %v4336_v52, %v3722_v60  ;;  %v3796_v36 = vpop.f32.mrb[7].mxu1 }
 0x909   : > { %v3797_v58 = vadd.f32 %v3796_v36, %v3717_v40 }
 0x90a   : > { %v3808_v43 = vmul.f32 0.1, %v3802_v32  ;;  %vm3806_vm6 = vcmp.ge.f32.partialorder %v3802_v32, 0.0 }
 0x90b   : > { %v3807_v49 = vmul.f32 0.1, %v3797_v58  ;;  %vm3805_vm1 = vcmp.ge.f32.partialorder %v3797_v58, 0.0 }
 0x90c   : > { %v3810_v44 = vsel %vm3806_vm6, %v3802_v32, %v3808_v43 }
 0x90d   : > { %v3820_v48 = vadd.f32 %v3817_v27, %v3810_v44  ;;  %v3809_v57 = vsel %vm3805_vm1, %v3797_v58, %v3807_v49 }
 0x90e   : > { %v3819_v59 = vadd.f32 %v3813_v28, %v3809_v57 }
 0x910   : > { %v4435_v55 = vpack.c.bf16 %v3820_v48, %v3819_v59 }
 0x912   : > { %4436 = vmatprep.subr.bf16.mxu1 %v4435_v55 }
 0x913   : > { %4438 = vmatpush3.bf16.msra.mxu1 %v4435_v55 }
 0x914   : > { %4440 = vmatprep.subr.bf16.mxu1 %v4439_v41 }
 0x916   : > { %4342 = vmatmul.mubr.msk.f32.vlgmr.msra.gmra.mrb[8].mxu1 %vm584_vm4, %v3823_v61 }
 0x917   : > { %4442 = vmatpush3.bf16.msra.mxu1 %v4439_v41 }
 0x918   : > { %4444 = vmatprep.subr.bf16.mxu1 %v4443_v31 }
 0x91b   : > { %4446 = vmatpush3.bf16.msra.mxu1 %v4443_v31 }
 0x91c   : > { %4448 = vmatprep.subr.bf16.mxu1 %v4447_v53 }
 0x91f   : > { %4450 = vmatpush3.bf16.msra.mxu1 %v4447_v53 }
 0x920   : > { %4452 = vmatprep.subr.bf16.mxu1 %v4451_v2 }
 0x923   : > { %4454 = vmatpush3.bf16.msra.mxu1 %v4451_v2 }
 0x9e9   : > { %v4343_v12 = vpop.f32.mrb[8].mxu1 }
 0x9ea   : > { %v3907_v7 = vpop.f32.mrb[9].mxu1  ;;  %v3913_v30 = vadd.f32 %v4343_v12, %v3833_v56 }
 0x9eb   : > { %v3908_v47 = vadd.f32 %v3907_v7, %v3828_v39 }
 0x9ec   : > { %v3919_v10 = vmul.f32 0.1, %v3913_v30  ;;  %vm3917_vm4 = vcmp.ge.f32.partialorder %v3913_v30, 0.0 }
 0x9ed   : > { %v3918_v13 = vmul.f32 0.1, %v3908_v47  ;;  %vm3916_vm3 = vcmp.ge.f32.partialorder %v3908_v47, 0.0 }
 0x9ee   : > { %v3921_v21 = vsel %vm3917_vm4, %v3913_v30, %v3919_v10 }
 0x9ef   : > { %v3920_v25 = vsel %vm3916_vm3, %v3908_v47, %v3918_v13  ;;  %v3931_v50 = vadd.f32 %v3928_v37, %v3921_v21 }
 0x9f0   : > { %v3930_v3 = vadd.f32 %v3924_v22, %v3920_v25 }
 0x9f2   : > { %4360 = vmatprep.mubr.msk.f32.mxu1 %vm3940_vm5, %v3930_v3 }
 0x9f3   : > { %4361 = vmatmul.mubr.msk.f32.vlgmr.msra.gmra.mrb[10].mxu1 %vm3940_vm5, %v3931_v50 }
 0xac6   : > { %v4362_v14 = vpop.f32.mrb[10].mxu1 }
 0xac7   : > { %4023 = vst.msk [vmem:[%s226_s28 + $0x8] sm:$0xff] %vm272_vm8, %v4362_v14  ;;  %v4013_v18 = vpop.f32.mrb[11].mxu1 }
 0xac8   : > { %4022 = vst.msk [vmem:[%s226_s28] sm:$0xff] %vm272_vm8, %v4013_v18 }
 0xac9 PF: > { %s15_s18 = sadd.s32 1, %s4744_s18  }
 0xaca   : > { %p12_p5 = scmp.ge.s32.totalorder %s15_s18, 4  }
 0xacc   :  { %14 = sbr.rel (!%p12_p5) target bundleno = 1 (0x1), region = 85 }

</bundles_post_ra>
